<compile_context>
chip_gen: v7x
topology: tpu7x:2x2x1
jax: 0.10.0
libtpu: 0.0.40
codegen_flags: <defaults>
</compile_context>

<pallas_src>
import functools

import jax
import jax.numpy as jnp
from jax.experimental import pallas as pl
from jax.experimental.pallas import tpu as pltpu


_LANES = 128      # lane width of a vreg / of the packed weight slab
_SUBLANE = 16     # bf16 packs 2 rows per 32-bit sublane -> (16,128) tiles


def _round_up(x, m):
    return (x + m - 1) // m * m


# ---------------------------------------------------------------------------
# Fused kernel: encoder MLP -> motion_embed (stays in VMEM) -> decoder MLP.
#   enc:  h  = x_enc @ W1e + b1e                         (single contiguous dot)
#         z  = sigmoid(cat([h, h^2, sin h, cos h]) @ W2e + b2e)   (4 partials)
#         me = sigmoid(z @ W3e + b3e)
#   dec:  hd = x_prev @ W1d_x + me @ W1d_e + b1d         (row-split partials)
#         zd = sigmoid(cat([hd, hd^2, sin hd, cos hd]) @ W2d + b2d)
#         y  = sigmoid(zd @ W3d + b3d)
# All weights live in ONE bf16 2-D-packed VMEM slab `w_ref`; `layout` maps
# sub-block name -> (row_off, lane_off, rows, cols), row offsets 16-aligned.
# ---------------------------------------------------------------------------
def _generator_kernel(x_ref, w_ref, o_ref, *, layout, x_prev_cols):
    f32 = jnp.float32

    def blk(name):
        r0, c0, rows, cols = layout[name]
        # Static slice of the resident slab (zero-cost view) + bf16->f32 upcast.
        return w_ref[r0:r0 + rows, c0:c0 + cols].astype(f32)

    def dot(a, b):
        return jnp.dot(a, b, preferred_element_type=f32)

    def fourier(h, tag):
        # cat([h, h^2, sin h, cos h], -1) @ W2  ==  sum of 4 partial matmuls;
        # each quarter is its own 16-row-aligned sub-block of the slab.
        z = (dot(h, blk(f"{tag}_w2_q0"))
             + dot(h * h, blk(f"{tag}_w2_q1"))
             + dot(jnp.sin(h), blk(f"{tag}_w2_q2"))
             + dot(jnp.cos(h), blk(f"{tag}_w2_q3"))
             + blk(f"{tag}_b2"))
        return jax.nn.sigmoid(z)

    x = x_ref[...]                                    # (tile_m, kp*12), f32

    # ---------------- encoder (motion_embed never leaves VMEM) -------------
    h = dot(x, blk("enc_w1")) + blk("enc_b1")
    z = fourier(h, "enc")
    me = jax.nn.sigmoid(dot(z, blk("enc_w3")) + blk("enc_b3"))

    # ---------------- decoder ----------------------------------------------
    # decode_in = [m_prev, v_prev, motion_embed]: row-split partial matmuls so
    # no concat of the VMEM-resident motion_embed is needed.
    hd = (dot(x[:, 0:x_prev_cols], blk("dec_w1_x"))
          + dot(me, blk("dec_w1_e"))
          + blk("dec_b1"))
    zd = fourier(hd, "dec")
    o_ref[...] = jax.nn.sigmoid(dot(zd, blk("dec_w3")) + blk("dec_b3"))


# ---------------------------------------------------------------------------
# Parameter construction (matches nn.Linear shapes + init_weights:
# xavier_uniform weights, bias filled with 0.01). Weights kept as (in, out).
# ---------------------------------------------------------------------------
def _xavier_uniform(key, fan_out, fan_in):
    limit = (6.0 / (fan_in + fan_out)) ** 0.5
    return jax.random.uniform(key, (fan_out, fan_in), jnp.float32, -limit, limit)


def make_mlp_params(key, in_features, out_features):
    k1, k2, k3 = jax.random.split(key, 3)
    return {
        "w1": _xavier_uniform(k1, 2 * in_features, in_features).T,       # (in, 2in)
        "b1": jnp.full((1, 2 * in_features), 0.01, jnp.float32),
        "w2": _xavier_uniform(k2, 2 * out_features, 8 * in_features).T,  # (8in, 2out)
        "b2": jnp.full((1, 2 * out_features), 0.01, jnp.float32),
        "w3": _xavier_uniform(k3, out_features, 2 * out_features).T,     # (2out, out)
        "b3": jnp.full((1, out_features), 0.01, jnp.float32),
    }


def make_generator_params(key, num_kp, embedsize):
    ke, kd = jax.random.split(key, 2)
    return {
        "enc": make_mlp_params(ke, in_features=num_kp * 12, out_features=embedsize),
        "dec": make_mlp_params(kd, in_features=embedsize + num_kp * 6,
                               out_features=num_kp * 6),
        # TODO(synk): motion_advdecoder (mode==2 adversarial branch) omitted;
        # only the mode==0 forward path is implemented.
    }


def quantize_params_bf16(params):
    """Round weights/biases to bf16 values (what the packed slab stores)."""
    return jax.tree_util.tree_map(
        lambda a: a.astype(jnp.bfloat16).astype(jnp.float32), params)


def pack_generator_params(params, embedsize, dtype=jnp.bfloat16):
    """2-D shelf-pack every weight/bias sub-block into ONE (R, 128) slab.

    * One weight DMA per call for all 6 Linear layers.
    * Narrow blocks are co-located in unused lane ranges of taller blocks,
      removing the ~5x lane-padding inflation of the 1-D layout.
    * Every sub-block the kernel slices (fourier quarters, dec_w1 x/embed
      split, every bias) gets its own 16-row-aligned entry, so no slice
      crosses a bf16 (16,128) tile row boundary.
    * Stored as bf16 (halves DMA bytes); kernel upcasts to f32 and accumulates
      in f32, so only weight storage is quantized.

    Returns (slab, layout) with layout[name] = (row_off, lane_off, rows, cols).
    """
    blocks = []

    def add(name, arr):
        blocks.append((name, jnp.asarray(arr, jnp.float32)))

    for tag in ("enc", "dec"):
        p = params[tag]
        kdim = p["w1"].shape[1]                     # width of h = 2*in_features
        if tag == "enc":
            add("enc_w1", p["w1"])
        else:
            n_x = p["w1"].shape[0] - embedsize      # rows fed by [m_prev, v_prev]
            add("dec_w1_x", p["w1"][:n_x])
            add("dec_w1_e", p["w1"][n_x:])          # rows fed by motion_embed
        add(f"{tag}_b1", p["b1"])
        for q in range(4):                          # h, h^2, sin h, cos h
            add(f"{tag}_w2_q{q}", p["w2"][q * kdim:(q + 1) * kdim])
        add(f"{tag}_b2", p["b2"])
        add(f"{tag}_w3", p["w3"])
        add(f"{tag}_b3", p["b3"])

    # TODO(synk): blocks wider than 128 lanes (much larger num_kp) would need a
    # multi-lane-tile slab; not required for these shapes.
    assert all(a.shape[1] <= _LANES for _, a in blocks)

    # Shelf packing: tallest (then widest) first; place left-to-right on the
    # first shelf with enough height and remaining lanes, else open a shelf.
    order = sorted(blocks, key=lambda t: (-_round_up(t[1].shape[0], _SUBLANE),
                                          -t[1].shape[1]))
    shelves = []            # each: [row_off, height, lane_cursor]
    layout = {}
    total_rows = 0
    for name, arr in order:
        rows, cols = arr.shape
        rp = _round_up(rows, _SUBLANE)
        for sh in shelves:
            if rp <= sh[1] and sh[2] + cols <= _LANES:
                layout[name] = (sh[0], sh[2], rows, cols)
                sh[2] += cols
                break
        else:
            layout[name] = (total_rows, 0, rows, cols)
            shelves.append([total_rows, rp, cols])
            total_rows += rp

    slab = jnp.zeros((total_rows, _LANES), jnp.float32)
    for name, arr in blocks:
        r0, c0, rows, cols = layout[name]
        slab = slab.at[r0:r0 + rows, c0:c0 + cols].set(arr)
    return slab.astype(dtype), layout


# ---------------------------------------------------------------------------
# MotionEmbeddingGenerator.forward, mode == 0 (single fused pallas_call).
# ---------------------------------------------------------------------------
def build_forward(layout, num_kp, tile_m_max=512):
    kp2, kp4 = num_kp * 2, num_kp * 4
    in_dim = 2 * (kp2 + kp4)                       # = num_kp * 12
    out_dim = num_kp * 6
    kernel = functools.partial(_generator_kernel, layout=layout,
                               x_prev_cols=kp2 + kp4)

    @jax.jit
    def forward(slab, kp_mean, kp_var):
        """kp_mean: (bz, frame, kp, 2), kp_var: (bz, frame, kp, 2, 2)
           -> (bz, frame-1, kp*6)."""
        bz, frame = kp_mean.shape[0], kp_mean.shape[1]
        n = bz * (frame - 1)
        mean_flat = kp_mean.reshape(bz, frame, -1)   # (bz, frame, kp*2)
        var_flat = kp_var.reshape(bz, frame, -1)     # (bz, frame, kp*4)
        # Single fused activation slab [m_prev | v_prev | m_next | v_next]
        # -> one input DMA instead of four sub-1KiB latency-bound ones.
        x = jnp.concatenate(
            [mean_flat[:, :-1], var_flat[:, :-1],
             mean_flat[:, 1:], var_flat[:, 1:]], axis=-1).reshape(n, in_dim)

        # Row grid: up to tile_m_max rows per step ("parallel" -> both TCs on
        # v7x when n is large, bounded per-step VMEM); pad n to a tile multiple.
        tile_m = min(tile_m_max, _round_up(n, 8))
        n_pad = _round_up(n, tile_m)
        if n_pad != n:
            x = jnp.pad(x, ((0, n_pad - n), (0, 0)))

        out = pl.pallas_call(
            kernel,
            out_shape=jax.ShapeDtypeStruct((n_pad, out_dim), jnp.float32),
            grid=(n_pad // tile_m,),
            in_specs=[pl.BlockSpec((tile_m, in_dim), lambda i: (i, 0)),
                      pl.BlockSpec(slab.shape, lambda i: (0, 0))],  # resident weights
            out_specs=pl.BlockSpec((tile_m, out_dim), lambda i: (i, 0)),
            compiler_params=pltpu.CompilerParams(
                dimension_semantics=("parallel",)),
        )(x, slab)
        # TODO(synk): if forward() is called per training step, amortize launch
        # overhead further by batching several clips per call or prefetching
        # the weight slab with a cross-call DMA future (P10).
        # TODO(synk): for very large n on v5e, emit a 128-lane-padded output
        # block (lane-dense stores) and slice back in the wrapper.
        return out[:n].reshape(bz, frame - 1, out_dim)

    return forward


# ---------------------------------------------------------------------------
# Pure-JAX reference (validates the Pallas lowering of the mode==0 path).
# ---------------------------------------------------------------------------
def _mlp_ref(p, x):
    h = x @ p["w1"] + p["b1"]
    f = jnp.concatenate([h, h * h, jnp.sin(h), jnp.cos(h)], -1)
    z = jax.nn.sigmoid(f @ p["w2"] + p["b2"])
    return jax.nn.sigmoid(z @ p["w3"] + p["b3"])


def _forward_ref(params, kp_mean, kp_var):
    bz, frame = kp_mean.shape[0], kp_mean.shape[1]
    mean_flat = kp_mean.reshape(bz, frame, -1)
    var_flat = kp_var.reshape(bz, frame, -1)
    n = bz * (frame - 1)
    encode_in = jnp.concatenate(
        [mean_flat[:, :-1], var_flat[:, :-1], mean_flat[:, 1:], var_flat[:, 1:]], -1)
    me = _mlp_ref(params["enc"], encode_in.reshape(n, -1))
    decode_in = jnp.concatenate(
        [mean_flat[:, :-1].reshape(n, -1), var_flat[:, :-1].reshape(n, -1), me], -1)
    return _mlp_ref(params["dec"], decode_in).reshape(bz, frame - 1, -1)


if __name__ == "__main__":
    # Small, module-consistent shapes.
    bz, frame, num_kp, embedsize = 2, 8, 4, 2

    key = jax.random.PRNGKey(0)
    k_params, k_mean, k_var = jax.random.split(key, 3)

    params = make_generator_params(k_params, num_kp=num_kp, embedsize=embedsize)
    params = quantize_params_bf16(params)     # weights live in bf16 on-chip
    slab, layout = pack_generator_params(params, embedsize=embedsize)
    forward = build_forward(layout, num_kp=num_kp)

    kp_mean = jax.random.normal(k_mean, (bz, frame, num_kp, 2), jnp.float32)
    kp_var = jax.random.normal(k_var, (bz, frame, num_kp, 2, 2), jnp.float32) * 0.1

    out = jax.block_until_ready(forward(slab, kp_mean, kp_var))

    ref = _forward_ref(params, kp_mean, kp_var)   # same bf16-rounded weights, f32 math
    assert out.shape == (bz, frame - 1, num_kp * 6), out.shape
    assert jnp.allclose(out, ref, atol=1e-4, rtol=1e-4), \
        float(jnp.max(jnp.abs(out - ref)))

    print("KERNEL_OK")
</pallas_src>

<mosaic_0001>
module attributes {stable_mosaic.version = 11 : i64} {
  func.func @_generator_kernel(%arg0: i32, %arg1: memref<16x48xf32, #tpu.memory_space<vmem>>, %arg2: memref<272x128xbf16, #tpu.memory_space<vmem>>, %arg3: memref<16x24xf32, #tpu.memory_space<vmem>>) attributes {dimension_semantics = [#tpu.dimension_semantics<parallel>], iteration_bounds = array<i64: 1>, scalar_prefetch = 0 : i64, scratch_operands = 0 : i64, tpu.core_type = #tpu.core_type<tc>, window_params = [{transform_indices = @transform_0, window_bounds = array<i64: 16, 48>}, {pipeline_mode = #tpu.pipeline_mode<synchronous>, transform_indices = @transform_1, window_bounds = array<i64: 272, 128>}, {transform_indices = @transform_2, window_bounds = array<i64: 16, 24>}]} {
    %c0 = arith.constant 0 : index
    %c0_0 = arith.constant 0 : index
    %0 = vector.load %arg1[%c0, %c0_0] : memref<16x48xf32, #tpu.memory_space<vmem>>, vector<16x48xf32>
    %c160 = arith.constant 160 : index
    %c0_1 = arith.constant 0 : index
    %1 = vector.load %arg2[%c160, %c0_1] : memref<272x128xbf16, #tpu.memory_space<vmem>>, vector<48x96xbf16>
    %2 = arith.extf %1 : vector<48x96xbf16> to vector<48x96xf32>
    %cst = arith.constant dense<0.000000e+00> : vector<16x96xf32>
    %3 = tpu.matmul %0, %2, %cst {dimension_numbers = #tpu.dot_dimension_numbers<[1], [0], [0], [1], [0, 0, 1, 1], [], []>} : vector<16x48xf32>, vector<48x96xf32>, vector<16x96xf32> -> vector<16x96xf32>
    %c240 = arith.constant 240 : index
    %c0_2 = arith.constant 0 : index
    %4 = vector.load %arg2[%c240, %c0_2] : memref<272x128xbf16, #tpu.memory_space<vmem>>, vector<1x96xbf16>
    %5 = arith.extf %4 : vector<1x96xbf16> to vector<1x96xf32>
    %6 = vector.broadcast %5 : vector<1x96xf32> to vector<16x96xf32>
    %7 = arith.addf %3, %6 : vector<16x96xf32>
    %c0_3 = arith.constant 0 : index
    %c0_4 = arith.constant 0 : index
    %8 = vector.load %arg2[%c0_3, %c0_4] : memref<272x128xbf16, #tpu.memory_space<vmem>>, vector<96x4xbf16>
    %9 = arith.extf %8 : vector<96x4xbf16> to vector<96x4xf32>
    %cst_5 = arith.constant dense<0.000000e+00> : vector<16x4xf32>
    %10 = tpu.matmul %7, %9, %cst_5 {dimension_numbers = #tpu.dot_dimension_numbers<[1], [0], [0], [1], [0, 0, 1, 1], [], []>} : vector<16x96xf32>, vector<96x4xf32>, vector<16x4xf32> -> vector<16x4xf32>
    %11 = arith.mulf %7, %7 : vector<16x96xf32>
    %c0_6 = arith.constant 0 : index
    %c4 = arith.constant 4 : index
    %12 = vector.load %arg2[%c0_6, %c4] : memref<272x128xbf16, #tpu.memory_space<vmem>>, vector<96x4xbf16>
    %13 = arith.extf %12 : vector<96x4xbf16> to vector<96x4xf32>
    %cst_7 = arith.constant dense<0.000000e+00> : vector<16x4xf32>
    %14 = tpu.matmul %11, %13, %cst_7 {dimension_numbers = #tpu.dot_dimension_numbers<[1], [0], [0], [1], [0, 0, 1, 1], [], []>} : vector<16x96xf32>, vector<96x4xf32>, vector<16x4xf32> -> vector<16x4xf32>
    %15 = arith.addf %10, %14 : vector<16x4xf32>
    %16 = math.sin %7 : vector<16x96xf32>
    %c0_8 = arith.constant 0 : index
    %c8 = arith.constant 8 : index
    %17 = vector.load %arg2[%c0_8, %c8] : memref<272x128xbf16, #tpu.memory_space<vmem>>, vector<96x4xbf16>
    %18 = arith.extf %17 : vector<96x4xbf16> to vector<96x4xf32>
    %cst_9 = arith.constant dense<0.000000e+00> : vector<16x4xf32>
    %19 = tpu.matmul %16, %18, %cst_9 {dimension_numbers = #tpu.dot_dimension_numbers<[1], [0], [0], [1], [0, 0, 1, 1], [], []>} : vector<16x96xf32>, vector<96x4xf32>, vector<16x4xf32> -> vector<16x4xf32>
    %20 = arith.addf %15, %19 : vector<16x4xf32>
    %21 = math.cos %7 : vector<16x96xf32>
    %c0_10 = arith.constant 0 : index
    %c12 = arith.constant 12 : index
    %22 = vector.load %arg2[%c0_10, %c12] : memref<272x128xbf16, #tpu.memory_space<vmem>>, vector<96x4xbf16>
    %23 = arith.extf %22 : vector<96x4xbf16> to vector<96x4xf32>
    %cst_11 = arith.constant dense<0.000000e+00> : vector<16x4xf32>
    %24 = tpu.matmul %21, %23, %cst_11 {dimension_numbers = #tpu.dot_dimension_numbers<[1], [0], [0], [1], [0, 0, 1, 1], [], []>} : vector<16x96xf32>, vector<96x4xf32>, vector<16x4xf32> -> vector<16x4xf32>
    %25 = arith.addf %20, %24 : vector<16x4xf32>
    %c0_12 = arith.constant 0 : index
    %c112 = arith.constant 112 : index
    %26 = vector.load %arg2[%c0_12, %c112] : memref<272x128xbf16, #tpu.memory_space<vmem>>, vector<1x4xbf16>
    %27 = arith.extf %26 : vector<1x4xbf16> to vector<1x4xf32>
    %28 = vector.broadcast %27 : vector<1x4xf32> to vector<16x4xf32>
    %29 = arith.addf %25, %28 : vector<16x4xf32>
    %30 = arith.negf %29 : vector<16x4xf32>
    %31 = math.exp %30 : vector<16x4xf32>
    %cst_13 = arith.constant 1.000000e+00 : f32
    %32 = vector.broadcast %cst_13 : f32 to vector<16x4xf32>
    %33 = arith.addf %32, %31 : vector<16x4xf32>
    %34 = arith.divf %32, %33 : vector<16x4xf32>
    %c0_14 = arith.constant 0 : index
    %c116 = arith.constant 116 : index
    %35 = vector.load %arg2[%c0_14, %c116] : memref<272x128xbf16, #tpu.memory_space<vmem>>, vector<4x2xbf16>
    %36 = arith.extf %35 : vector<4x2xbf16> to vector<4x2xf32>
    %cst_15 = arith.constant dense<0.000000e+00> : vector<16x2xf32>
    %37 = tpu.matmul %34, %36, %cst_15 {dimension_numbers = #tpu.dot_dimension_numbers<[1], [0], [0], [1], [0, 0, 1, 1], [], []>} : vector<16x4xf32>, vector<4x2xf32>, vector<16x2xf32> -> vector<16x2xf32>
    %c0_16 = arith.constant 0 : index
    %c118 = arith.constant 118 : index
    %38 = vector.load %arg2[%c0_16, %c118] : memref<272x128xbf16, #tpu.memory_space<vmem>>, vector<1x2xbf16>
    %39 = arith.extf %38 : vector<1x2xbf16> to vector<1x2xf32>
    %40 = vector.broadcast %39 : vector<1x2xf32> to vector<16x2xf32>
    %41 = arith.addf %37, %40 : vector<16x2xf32>
    %42 = arith.negf %41 : vector<16x2xf32>
    %43 = math.exp %42 : vector<16x2xf32>
    %cst_17 = arith.constant 1.000000e+00 : f32
    %44 = vector.broadcast %cst_17 : f32 to vector<16x2xf32>
    %45 = arith.addf %44, %43 : vector<16x2xf32>
    %46 = arith.divf %44, %45 : vector<16x2xf32>
    %47 = vector.extract_strided_slice %0 {offsets = [0, 0], sizes = [16, 24], strides = [1, 1]} : vector<16x48xf32> to vector<16x24xf32>
    %c208 = arith.constant 208 : index
    %c0_18 = arith.constant 0 : index
    %48 = vector.load %arg2[%c208, %c0_18] : memref<272x128xbf16, #tpu.memory_space<vmem>>, vector<24x52xbf16>
    %49 = arith.extf %48 : vector<24x52xbf16> to vector<24x52xf32>
    %cst_19 = arith.constant dense<0.000000e+00> : vector<16x52xf32>
    %50 = tpu.matmul %47, %49, %cst_19 {dimension_numbers = #tpu.dot_dimension_numbers<[1], [0], [0], [1], [0, 0, 1, 1], [], []>} : vector<16x24xf32>, vector<24x52xf32>, vector<16x52xf32> -> vector<16x52xf32>
    %c208_20 = arith.constant 208 : index
    %c52 = arith.constant 52 : index
    %51 = vector.load %arg2[%c208_20, %c52] : memref<272x128xbf16, #tpu.memory_space<vmem>>, vector<2x52xbf16>
    %52 = arith.extf %51 : vector<2x52xbf16> to vector<2x52xf32>
    %cst_21 = arith.constant dense<0.000000e+00> : vector<16x52xf32>
    %53 = tpu.matmul %46, %52, %cst_21 {dimension_numbers = #tpu.dot_dimension_numbers<[1], [0], [0], [1], [0, 0, 1, 1], [], []>} : vector<16x2xf32>, vector<2x52xf32>, vector<16x52xf32> -> vector<16x52xf32>
    %54 = arith.addf %50, %53 : vector<16x52xf32>
    %c256 = arith.constant 256 : index
    %c0_22 = arith.constant 0 : index
    %55 = vector.load %arg2[%c256, %c0_22] : memref<272x128xbf16, #tpu.memory_space<vmem>>, vector<1x52xbf16>
    %56 = arith.extf %55 : vector<1x52xbf16> to vector<1x52xf32>
    %57 = vector.broadcast %56 : vector<1x52xf32> to vector<16x52xf32>
    %58 = arith.addf %54, %57 : vector<16x52xf32>
    %c0_23 = arith.constant 0 : index
    %c16 = arith.constant 16 : index
    %59 = vector.load %arg2[%c0_23, %c16] : memref<272x128xbf16, #tpu.memory_space<vmem>>, vector<52x48xbf16>
    %60 = arith.extf %59 : vector<52x48xbf16> to vector<52x48xf32>
    %cst_24 = arith.constant dense<0.000000e+00> : vector<16x48xf32>
    %61 = tpu.matmul %58, %60, %cst_24 {dimension_numbers = #tpu.dot_dimension_numbers<[1], [0], [0], [1], [0, 0, 1, 1], [], []>} : vector<16x52xf32>, vector<52x48xf32>, vector<16x48xf32> -> vector<16x48xf32>
    %62 = arith.mulf %58, %58 : vector<16x52xf32>
    %c0_25 = arith.constant 0 : index
    %c64 = arith.constant 64 : index
    %63 = vector.load %arg2[%c0_25, %c64] : memref<272x128xbf16, #tpu.memory_space<vmem>>, vector<52x48xbf16>
    %64 = arith.extf %63 : vector<52x48xbf16> to vector<52x48xf32>
    %cst_26 = arith.constant dense<0.000000e+00> : vector<16x48xf32>
    %65 = tpu.matmul %62, %64, %cst_26 {dimension_numbers = #tpu.dot_dimension_numbers<[1], [0], [0], [1], [0, 0, 1, 1], [], []>} : vector<16x52xf32>, vector<52x48xf32>, vector<16x48xf32> -> vector<16x48xf32>
    %66 = arith.addf %61, %65 : vector<16x48xf32>
    %67 = math.sin %58 : vector<16x52xf32>
    %c96 = arith.constant 96 : index
    %c0_27 = arith.constant 0 : index
    %68 = vector.load %arg2[%c96, %c0_27] : memref<272x128xbf16, #tpu.memory_space<vmem>>, vector<52x48xbf16>
    %69 = arith.extf %68 : vector<52x48xbf16> to vector<52x48xf32>
    %cst_28 = arith.constant dense<0.000000e+00> : vector<16x48xf32>
    %70 = tpu.matmul %67, %69, %cst_28 {dimension_numbers = #tpu.dot_dimension_numbers<[1], [0], [0], [1], [0, 0, 1, 1], [], []>} : vector<16x52xf32>, vector<52x48xf32>, vector<16x48xf32> -> vector<16x48xf32>
    %71 = arith.addf %66, %70 : vector<16x48xf32>
    %72 = math.cos %58 : vector<16x52xf32>
    %c96_29 = arith.constant 96 : index
    %c48 = arith.constant 48 : index
    %73 = vector.load %arg2[%c96_29, %c48] : memref<272x128xbf16, #tpu.memory_space<vmem>>, vector<52x48xbf16>
    %74 = arith.extf %73 : vector<52x48xbf16> to vector<52x48xf32>
    %cst_30 = arith.constant dense<0.000000e+00> : vector<16x48xf32>
    %75 = tpu.matmul %72, %74, %cst_30 {dimension_numbers = #tpu.dot_dimension_numbers<[1], [0], [0], [1], [0, 0, 1, 1], [], []>} : vector<16x52xf32>, vector<52x48xf32>, vector<16x48xf32> -> vector<16x48xf32>
    %76 = arith.addf %71, %75 : vector<16x48xf32>
    %c256_31 = arith.constant 256 : index
    %c52_32 = arith.constant 52 : index
    %77 = vector.load %arg2[%c256_31, %c52_32] : memref<272x128xbf16, #tpu.memory_space<vmem>>, vector<1x48xbf16>
    %78 = arith.extf %77 : vector<1x48xbf16> to vector<1x48xf32>
    %79 = vector.broadcast %78 : vector<1x48xf32> to vector<16x48xf32>
    %80 = arith.addf %76, %79 : vector<16x48xf32>
    %81 = arith.negf %80 : vector<16x48xf32>
    %82 = math.exp %81 : vector<16x48xf32>
    %cst_33 = arith.constant 1.000000e+00 : f32
    %83 = vector.broadcast %cst_33 : f32 to vector<16x48xf32>
    %84 = arith.addf %83, %82 : vector<16x48xf32>
    %85 = arith.divf %83, %84 : vector<16x48xf32>
    %c96_34 = arith.constant 96 : index
    %c96_35 = arith.constant 96 : index
    %86 = vector.load %arg2[%c96_34, %c96_35] : memref<272x128xbf16, #tpu.memory_space<vmem>>, vector<48x24xbf16>
    %87 = arith.extf %86 : vector<48x24xbf16> to vector<48x24xf32>
    %cst_36 = arith.constant dense<0.000000e+00> : vector<16x24xf32>
    %88 = tpu.matmul %85, %87, %cst_36 {dimension_numbers = #tpu.dot_dimension_numbers<[1], [0], [0], [1], [0, 0, 1, 1], [], []>} : vector<16x48xf32>, vector<48x24xf32>, vector<16x24xf32> -> vector<16x24xf32>
    %c160_37 = arith.constant 160 : index
    %c96_38 = arith.constant 96 : index
    %89 = vector.load %arg2[%c160_37, %c96_38] : memref<272x128xbf16, #tpu.memory_space<vmem>>, vector<1x24xbf16>
    %90 = arith.extf %89 : vector<1x24xbf16> to vector<1x24xf32>
    %91 = vector.broadcast %90 : vector<1x24xf32> to vector<16x24xf32>
    %92 = arith.addf %88, %91 : vector<16x24xf32>
    %93 = arith.negf %92 : vector<16x24xf32>
    %94 = math.exp %93 : vector<16x24xf32>
    %cst_39 = arith.constant 1.000000e+00 : f32
    %95 = vector.broadcast %cst_39 : f32 to vector<16x24xf32>
    %96 = arith.addf %95, %94 : vector<16x24xf32>
    %97 = arith.divf %95, %96 : vector<16x24xf32>
    %c0_40 = arith.constant 0 : index
    %c0_41 = arith.constant 0 : index
    %98 = vector.load %arg3[%c0_40, %c0_41] : memref<16x24xf32, #tpu.memory_space<vmem>>, vector<16x24xf32>
    tpu.vector_store %arg3[%c0_40, %c0_41], %97 {strides = array<i32>} : memref<16x24xf32, #tpu.memory_space<vmem>>, vector<16x24xf32>,
    return
  }
  func.func @transform_0(%arg0: i32) -> (i32, i32) {
    %c0_i32 = arith.constant 0 : i32
    %c0_i32_0 = arith.constant 0 : i32
    return %arg0, %c0_i32 : i32, i32
  }
  func.func @transform_1(%arg0: i32) -> (i32, i32) {
    %c0_i32 = arith.constant 0 : i32
    %c0_i32_0 = arith.constant 0 : i32
    %c0_i32_1 = arith.constant 0 : i32
    return %c0_i32, %c0_i32_0 : i32, i32
  }
  func.func @transform_2(%arg0: i32) -> (i32, i32) {
    %c0_i32 = arith.constant 0 : i32
    %c0_i32_0 = arith.constant 0 : i32
    return %arg0, %c0_i32 : i32, i32
  }
}

</mosaic_0001>

<bundles_post_ra>
// kernel: forward.1
= control target key start
LH: loop header
LB: loop body
LE: loop exit
PB: predicated region body
PF: predicated region fallthrough
CT: control target
= control target key end

     0   :  { %vm31_vm0 = vcmask 392192   ;;  %s3260_s29 = smov 124   ;;  %s3261_s4 = smov 120   ;;  %v27_v53 = vlaneseq  ;;  %vm187_vm1 = vcmask 785408   ;;  %s3821_s1 = inlined_call_operand.vmem [shape: bf16[272,128], index: 1, kind: input, shape index: {}]   ;;  %s3822_s0 = inlined_call_operand.vmem [shape: f32[16,48], index: 0, kind: input, shape index: {}]   ;;  %s3823_s2 = inlined_call_operand.vmem [shape: f32[16,24], index: 2, kind: output, shape index: {}]  }
   0x1   :  { %v2481_v0 = vld [vmem:[%s3821_s1 + $0x50] sm:$0xff]   ;;  %v2482_v1 = vld [vmem:[%s3821_s1 + $0x58] sm:$0xff]   ;;  %v11_v2 = vld [vmem:[%s3822_s0] sm:$0xff]  ;;  %s3262_s5 = smov 116   ;;  %s3263_s12 = smov 12  }
   0x2   :  { %2843 = vmatprep.subr.bf16.mxu0 %v2481_v0  ;;  %v3304_v3 = vld [vmem:[%s3821_s1] sm:$0xff]   ;;  %2629 = vmatprep.mubr.msk.f32.mxu0 %vm31_vm0, %v11_v2  ;;  %v3312_v6 = vld [vmem:[%s3821_s1 + $0x8] sm:$0xff]   ;;  %v3317_v7 = vld [vmem:[%s3821_s1 + $0x10] sm:$0xff]   ;;  %v28_v54 = vshrl.u32 %v27_v53, 7  ;;  %s3264_s13 = smov 16   ;;  %s3271_s16 = smov 10  }
   0x3   :  { %2845 = vmatpush3.bf16.msra.mxu0 %v2481_v0  ;;  %v2419_v4 = vunpack.c.l.bf16 %v3304_v3  ;;  %v2420_v5 = vunpack.c.h.bf16 %v3304_v3  ;;  %v3322_v8 = vld [vmem:[%s3821_s1 + $0x18] sm:$0xff]   ;;  %v2423_v9 = vunpack.c.l.bf16 %v3312_v6  ;;  %v2424_v10 = vunpack.c.h.bf16 %v3312_v6  ;;  %v3331_v13 = vld [vmem:[%s3821_s1 + $0x20] sm:$0xff]   ;;  %v3343_v18 = vld [vmem:[%s3821_s1 + $0x28] sm:$0xff]   ;;  %s3272_s17 = smov 76   ;;  %s3273_s22 = smov 64  }
   0x4   :  { %2847 = vmatprep.subr.bf16.mxu0 %v2482_v1  ;;  %v2427_v11 = vunpack.c.l.bf16 %v3317_v7  ;;  %v2428_v12 = vunpack.c.h.bf16 %v3317_v7  ;;  %v2483_v14 = vld [vmem:[%s3821_s1 + $0x60] sm:$0xff]   ;;  %v2431_v16 = vunpack.c.l.bf16 %v3322_v8  ;;  %v2432_v17 = vunpack.c.h.bf16 %v3322_v8  ;;  %v3358_v26 = vld [vmem:[%s3822_s0 + $0x8] sm:$0xff]  ;;  %v25_v55 = vld [vmem:[%s3821_s1 + $0x78] sm:$0x1]  ;;  %s3274_s27 = smov 112   ;;  %s3276_s10 = smov 32  }
   0x5   :  { %v3336_v15 = vpack.i.bf16 %v2420_v5, %v2419_v4  ;;  %v3348_v20 = vpack.i.bf16 %v2424_v10, %v2423_v9  ;;  %v2435_v21 = vunpack.c.l.bf16 %v3331_v13  ;;  %v2436_v22 = vunpack.c.h.bf16 %v3331_v13  ;;  %v1002_v56 = vld [vmem:[%s3821_s1] sm:$0x1] }
   0x6   :  { %v3345_v19 = vpack.i.bf16 %v2428_v12, %v2427_v11  ;;  %v3076_v23 = vpack.i.bf16 %v2432_v17, %v2431_v16  ;;  %v2439_v24 = vunpack.c.l.bf16 %v3343_v18  ;;  %v2440_v25 = vunpack.c.h.bf16 %v3343_v18  ;;  %v1026_v57 = vld [vmem:[%s3821_s1] sm:$0x3] }
   0x7   :  { %2849 = vmatpush3.bf16.msra.mxu0 %v2482_v1  ;;  %3062 = vrot.lane.b32.xlu0 %v3336_v15, %s3260_s29  ;;  %v3081_v27 = vpack.i.bf16 %v2436_v22, %v2435_v21  ;;  %v3379_v58 = vsub.s32 0, %v28_v54  ;;  %v1003_v59 = vunpack.c.l.bf16 %v1002_v56  ;;  %v1027_v60 = vunpack.c.l.bf16 %v1026_v57 }
   0x8   :  { %2851 = vmatprep.subr.bf16.mxu0 %v2483_v14  ;;  %3072 = vrot.lane.b32.xlu1 %v3345_v19, %s3260_s29  ;;  %v3086_v28 = vpack.i.bf16 %v2440_v25, %v2439_v24  ;;  %v26_v61 = vunpack.c.l.bf16 %v25_v55  ;;  %v3266_v55 = vmov 2475754826   ;;  %v3267_v57 = vmov 2131351028  }
   0x9   :  { %v3382_v62 = vrot.slane %v1003_v59, %v3379_v58 }
   0xa   :  { %v30_v63 = vrot.slane %v26_v61, %v3379_v58 }
   0xb   :  { %2853 = vmatpush3.bf16.msra.mxu0 %v2483_v14  ;;  %3067 = vrot.lane.b32.xlu0 %v3348_v20, %s3260_s29 }
   0xc   :  { %3077 = vrot.lane.b32.xlu1 %v3076_v23, %s3260_s29 }
   0xe   :  { %2630 = vmatmul.mubr.msk.f32.vlgmr.msra.gmra.mrb[0].mxu0 %vm31_vm0, %v3358_v26 }
   0xf   :  { %3082 = vrot.lane.b32.xlu0 %v3081_v27, %s3260_s29 }
  0x10   :  { %3087 = vrot.lane.b32.xlu1 %v3086_v28, %s3260_s29 }
  0x13   :  { %3092 = vrot.lane.b32.xlu0 %v3336_v15, %s3261_s4 }
  0x14   :  { %3097 = vrot.lane.b32.xlu1 %v3348_v20, %s3261_s4 }
  0x17   :  { %3102 = vrot.lane.b32.xlu0 %v3345_v19, %s3261_s4 }
  0x18   :  { %3107 = vrot.lane.b32.xlu1 %v3076_v23, %s3261_s4 }
  0x1b   :  { %3112 = vrot.lane.b32.xlu0 %v3081_v27, %s3261_s4 }
  0x1c   :  { %3117 = vrot.lane.b32.xlu1 %v3086_v28, %s3261_s4  ;;  %s3275_s4 = smov 80  }
  0x1f   :  { %3122 = vrot.lane.b32.xlu0 %v3336_v15, %s3262_s5 }
  0x20   :  { %3127 = vrot.lane.b32.xlu1 %v3348_v20, %s3262_s5 }
  0x23   :  { %3132 = vrot.lane.b32.xlu0 %v3345_v19, %s3262_s5 }
  0x24   :  { %3137 = vrot.lane.b32.xlu1 %v3076_v23, %s3262_s5 }
  0x27   :  { %3142 = vrot.lane.b32.xlu0 %v3081_v27, %s3262_s5 }
  0x28   :  { %3147 = vrot.lane.b32.xlu1 %v3086_v28, %s3262_s5 }
  0x2b   :  { %1009 = vrot.lane.b32.xlu0 %v3382_v62, %s3264_s13 }
  0x2c   :  { %1029 = vrot.lane.b32.xlu1 %v1027_v60, %s3263_s12 }
  0x2f   :  { %1031 = vrot.lane.b32.xlu0 %v3382_v62, %s3271_s16 }
  0x33   :  { %3152 = vrot.lane.b32.xlu0 %v3336_v15, %s3273_s22 }
  0x37   :  { %3162 = vrot.lane.b32.xlu0 %v3345_v19, %s3273_s22 }
  0x3b   :  { %3167 = vrot.lane.b32.xlu0 %v3336_v15, %s3274_s27 }
  0x3f   :  { %3177 = vrot.lane.b32.xlu0 %v3345_v19, %s3274_s27 }
  0x79   :  { %v3063_v29 = vpop.permute.xlu0 %3062 }
  0x7a   :  { %v3065_v30 = vunpack.i.h.bf16 %v3063_v29  ;;  %v3064_v31 = vunpack.i.l.bf16 %v3063_v29  ;;  %v3073_v32 = vpop.permute.xlu1 %3072 }
  0x7b   :  { %v3075_v34 = vunpack.i.h.bf16 %v3073_v32  ;;  %v3074_v35 = vunpack.i.l.bf16 %v3073_v32 }
  0x7c   :  { %v2854_v33 = vpack.c.bf16 %v3065_v30, %v3064_v31 }
  0x7d   :  { %v3068_v36 = vpop.permute.xlu0 %3067  ;;  %v2862_v41 = vpack.c.bf16 %v3075_v34, %v3074_v35 }
  0x7e   :  { %v3070_v37 = vunpack.i.h.bf16 %v3068_v36  ;;  %v3069_v38 = vunpack.i.l.bf16 %v3068_v36  ;;  %2855 = vmatprep.subr.bf16.mxu1 %v2854_v33  ;;  %v3078_v39 = vpop.permute.xlu1 %3077 }
  0x7f   :  { %2857 = vmatpush3.bf16.msra.mxu1 %v2854_v33  ;;  %v3080_v42 = vunpack.i.h.bf16 %v3078_v39  ;;  %v3079_v43 = vunpack.i.l.bf16 %v3078_v39 }
  0x80   :  { %v2858_v40 = vpack.c.bf16 %v3070_v37, %v3069_v38 }
  0x81   :  { %v3083_v44 = vpop.permute.xlu0 %3082  ;;  %v2866_v45 = vpack.c.bf16 %v3080_v42, %v3079_v43 }
  0x82   :  { %2859 = vmatprep.subr.bf16.mxu1 %v2858_v40  ;;  %v3085_v46 = vunpack.i.h.bf16 %v3083_v44  ;;  %v3084_v47 = vunpack.i.l.bf16 %v3083_v44  ;;  %v3088_v48 = vpop.permute.xlu1 %3087 }
  0x83   :  { %2861 = vmatpush3.bf16.msra.mxu1 %v2858_v40  ;;  %v3090_v50 = vunpack.i.h.bf16 %v3088_v48  ;;  %v3089_v51 = vunpack.i.l.bf16 %v3088_v48 }
  0x84   :  { %2863 = vmatprep.subr.bf16.mxu1 %v2862_v41  ;;  %v2870_v49 = vpack.c.bf16 %v3085_v46, %v3084_v47 }
  0x85   :  { %v2874_v52 = vpack.c.bf16 %v3090_v50, %v3089_v51  ;;  %v3093_v9 = vpop.permute.xlu0 %3092  ;;  %v3265_v51 = vmov 683565275  }
  0x86   :  { %v3098_v17 = vpop.permute.xlu1 %3097  ;;  %v3095_v24 = vunpack.i.h.bf16 %v3093_v9  ;;  %v3094_v29 = vunpack.i.l.bf16 %v3093_v9 }
  0x87   :  { %2865 = vmatpush3.bf16.msra.mxu1 %v2862_v41  ;;  %v3100_v30 = vunpack.i.h.bf16 %v3098_v17  ;;  %v3099_v31 = vunpack.i.l.bf16 %v3098_v17 }
  0x88   :  { %2867 = vmatprep.subr.bf16.mxu1 %v2866_v45  ;;  %v3413_v39 = vpack.c.bf16 %v3095_v24, %v3094_v29 }
  0x89   :  { %v3103_v25 = vpop.permute.xlu0 %3102  ;;  %v3415_v40 = vpack.c.bf16 %v3100_v30, %v3099_v31 }
  0x8a   :  { %v3105_v34 = vunpack.i.h.bf16 %v3103_v25  ;;  %v3104_v35 = vunpack.i.l.bf16 %v3103_v25  ;;  %v3406_v36 = vpop.permute.xlu1 %3107 }
  0x8b   :  { %2869 = vmatpush3.bf16.msra.mxu1 %v2866_v45  ;;  %v3110_v43 = vunpack.i.h.bf16 %v3406_v36  ;;  %v3109_v44 = vunpack.i.l.bf16 %v3406_v36 }
  0x8c   :  { %2871 = vmatprep.subr.bf16.mxu1 %v2870_v49  ;;  %v3422_v47 = vpack.c.bf16 %v3105_v34, %v3104_v35 }
  0x8f   :  { %2873 = vmatpush3.bf16.msra.mxu1 %v2870_v49 }
  0x90   :  { %2875 = vmatprep.subr.bf16.mxu1 %v2874_v52 }
  0x93   :  { %2877 = vmatpush3.bf16.msra.mxu1 %v2874_v52 }
  0x94   :  { %2879 = vmatprep.subr.bf16.mxu1 %v3304_v3 }
  0xe1   :  { %v2631_v0 = vpop.f32.mrb[0].mxu0 }
  0xe2   :  { %v3386_v1 = vadd.f32 %v2631_v0, %v30_v63  ;;  %v104_v2 = vpop.f32.mrb[1].mxu0 }
  0xe3   :  { %v3388_v4 = vadd.f32 %v104_v2, %v30_v63  ;;  %v3268_v63 = vmov 2102212464  }
  0xe4   :  { %v457_v5 = vand.u32 2139095040, %v3386_v1  ;;  %v138_v16 = vmul.f32 %v3386_v1, %v3386_v1  ;;  %v454_v22 = vand.u32 2147483647, %v3386_v1 }
  0xe5   :  { %v353_v10 = vand.u32 2139095040, %v3388_v4  ;;  %v137_v11 = vmul.f32 %v3388_v4, %v3388_v4  ;;  %v350_v12 = vand.u32 2147483647, %v3388_v4  ;;  %vm352_vm14 = vcmp.lt.s32.totalorder %v3388_v4, 0 }
  0xe6   :  { %v458_v14 = vshrl.u32 %v457_v5, 23  ;;  %v3410_v37 = vand.u32 8388607, %v454_v22 }
  0xe7   :  { %v354_v21 = vshrl.u32 %v353_v10, 23  ;;  %2656 = vmatprep.mubr.msk.f32.mxu1 %vm187_vm1, %v137_v11  ;;  %v357_v27 = vand.u32 8388607, %v350_v12  ;;  %vm3533_vm15 = vcmp.le.f32.partialorder %v350_v12, 0.7853982 }
  0xe8   :  { %v2343_v23 = vadd.s32 4294967169, %v458_v14  ;;  %2657 = vmatmul.mubr.msk.f32.vlgmr.msra.gmra.mrb[0].mxu1 %vm187_vm1, %v138_v16  ;;  %v462_v48 = vor.u32 8388608, %v3410_v37  ;;  %v3270_v16 = vmov 1326507024  }
  0xe9   :  { %v2339_v28 = vadd.s32 4294967169, %v354_v21  ;;  %2881 = vmatpush3.bf16.msra.mxu1 %v3304_v3  ;;  %2683 = vmatprep.mubr.msk.f32.mxu1 %vm187_vm1, %v3388_v4  ;;  %v358_v3 = vor.u32 8388608, %v357_v27 }
  0xea   :  { %v464_v32 = vadd.s32 1, %v2343_v23  ;;  %2883 = vmatprep.subr.bf16.mxu1 %v3312_v6 }
  0xeb   :  { %v360_v33 = vadd.s32 1, %v2339_v28  ;;  %v3430_v50 = vshll.u32 %v358_v3, 8 }
  0xec   :  { %vm465_vm2 = vcmp.gt.s32.totalorder %v464_v32, 0 }
  0xed   :  { %v466_v38 = vsel %vm465_vm2, %v464_v32, 0  ;;  %vm361_vm3 = vcmp.gt.s32.totalorder %v360_v33, 0  ;;  %2885 = vmatpush3.bf16.msra.mxu1 %v3312_v6 }
  0xee   :  { %v3417_v41 = vand.u32 31, %v466_v38  ;;  %v362_v42 = vsel %vm361_vm3, %v360_v33, 0  ;;  %2887 = vmatprep.subr.bf16.mxu1 %v3317_v7  ;;  %v3425_v6 = vshrl.u32 %v466_v38, 5 }
  0xef   :  { %v363_v45 = vshrl.u32 %v362_v42, 5  ;;  %v364_v46 = vand.u32 31, %v362_v42 }
  0xf0   :  { %v3428_v49 = vsub.s32 32, %v3417_v41  ;;  %v471_v52 = vshll.u32 %v3265_v51, %v3417_v41  ;;  %v474_v56 = vshll.u32 %v3266_v55, %v3417_v41  ;;  %v477_v59 = vshll.u32 %v3267_v57, %v3417_v41 }
  0xf1   :  { %v365_v53 = vsub.s32 32, %v364_v46  ;;  %2889 = vmatpush3.bf16.msra.mxu1 %v3317_v7  ;;  %v367_v54 = vshll.u32 %v3265_v51, %v364_v46  ;;  %v370_v60 = vshll.u32 %v3266_v55, %v364_v46  ;;  %v373_v61 = vshll.u32 %v3267_v57, %v364_v46 }
  0xf2   :  { %2891 = vmatprep.subr.bf16.mxu1 %v3322_v8  ;;  %v376_v0 = vshll.u32 %v3268_v63, %v364_v46  ;;  %v3269_v7 = vmov 920167782   ;;  %vm382_vm4 = vcmp.lt.s32.totalorder %v363_v45, 1  ;;  %vm384_vm5 = vcmp.lt.s32.totalorder %v363_v45, 3 }
  0xf3   :  { %v379_v2 = vshll.u32 %v3269_v7, %v364_v46  ;;  %v368_v5 = vshrl.u32 %v3266_v55, %v365_v53  ;;  %v371_v9 = vshrl.u32 %v3267_v57, %v365_v53  ;;  %v374_v10 = vshrl.u32 %v3268_v63, %v365_v53 }
  0xf4   :  { %v366_v11 = vshrl.u32 %v3265_v51, %v365_v53  ;;  %v377_v14 = vshrl.u32 %v3269_v7, %v365_v53  ;;  %v380_v17 = vshrl.u32 %v3270_v16, %v365_v53  ;;  %vm385_vm6 = vcmp.lt.s32.totalorder %v363_v45, 4 }
  0xf5   :  { %2893 = vmatpush3.bf16.msra.mxu1 %v3322_v8  ;;  %v369_v21 = vor.u32 %v368_v5, %v367_v54  ;;  %v372_v23 = vor.u32 %v371_v9, %v370_v60  ;;  %v375_v24 = vor.u32 %v374_v10, %v373_v61  ;;  %v472_v28 = vshrl.u32 %v3266_v55, %v3428_v49 }
  0xf6   :  { %2895 = vmatprep.subr.bf16.mxu1 %v3331_v13  ;;  %v378_v25 = vor.u32 %v377_v14, %v376_v0  ;;  %v381_v27 = vor.u32 %v380_v17, %v379_v2  ;;  %v475_v29 = vshrl.u32 %v3267_v57, %v3428_v49  ;;  %vm383_vm7 = vcmp.lt.s32.totalorder %v363_v45, 2 }
  0xf7   :  { %v386_v30 = vsel %vm382_vm4, %v366_v11, %v369_v21  ;;  %v387_v31 = vsel %vm385_vm6, %v375_v24, 2102212464  ;;  %v390_v32 = vsel %vm382_vm4, %v369_v21, %v372_v23  ;;  %v394_v8 = vsel %vm382_vm4, %v372_v23, %v375_v24 }
  0xf8   :  { %v388_v33 = vsel %vm384_vm5, %v372_v23, %v387_v31  ;;  %v391_v34 = vsel %vm385_vm6, %v378_v25, 920167782  ;;  %v395_v35 = vsel %vm385_vm6, %v381_v27, 1326507024  ;;  %v473_v42 = vor.u32 %v472_v28, %v471_v52  ;;  %v3113_v27 = vpop.permute.xlu0 %3112 }
  0xf9   :  { %2897 = vmatpush3.bf16.msra.mxu1 %v3331_v13  ;;  %v389_v37 = vsel %vm383_vm7, %v386_v30, %v388_v33  ;;  %v392_v3 = vsel %vm384_vm5, %v375_v24, %v391_v34  ;;  %v396_v38 = vsel %vm384_vm5, %v378_v25, %v395_v35  ;;  %v476_v54 = vor.u32 %v475_v29, %v474_v56  ;;  %v3118_v33 = vpop.permute.xlu1 %3117 }
  0xfa   :  { %2899 = vmatprep.subr.bf16.mxu1 %v3343_v18  ;;  %v393_v46 = vsel %vm383_vm7, %v390_v32, %v392_v3  ;;  %v397_v53 = vsel %vm383_vm7, %v394_v8, %v396_v38  ;;  %v478_v60 = vshrl.u32 %v3268_v63, %v3428_v49  ;;  %v480_v52 = vshll.u32 %v3268_v63, %v3417_v41 }
  0xfb   :  { %v3468_v61 = vmul.u32.u64.low %v3430_v50, %v397_v53  ;;  %v3469_v0 = vmul.u32.u64.high %v3430_v50, %v397_v53, %v3468_v61  ;;  %v3472_v13 = vmul.u32.u64.low %v3430_v50, %v393_v46  ;;  %v3473_v2 = vmul.u32.u64.high %v3430_v50, %v393_v46, %v3472_v13 }
  0xfc   :  { %v479_v45 = vor.u32 %v478_v60, %v477_v59  ;;  %v481_v5 = vshrl.u32 %v3269_v7, %v3428_v49  ;;  %v3480_v56 = vshll.u32 %v462_v48, 8  ;;  %v405_v9 = vmul.u32 %v3430_v50, %v389_v37 }
  0xfd   :  { %2901 = vmatpush3.bf16.msra.mxu1 %v3343_v18  ;;  %v470_v10 = vshrl.u32 %v3265_v51, %v3428_v49  ;;  %v483_v11 = vshll.u32 %v3269_v7, %v3417_v41  ;;  %v484_v59 = vshrl.u32 %v3270_v16, %v3428_v49  ;;  %vm486_vm8 = vcmp.lt.s32.totalorder %v3425_v6, 1 }
  0xfe   :  { %2903 = vmatprep.subr.bf16.mxu1 %v3413_v39  ;;  %v482_v14 = vor.u32 %v481_v5, %v480_v52  ;;  %vm487_vm9 = vcmp.lt.s32.totalorder %v3425_v6, 2  ;;  %vm489_vm10 = vcmp.lt.s32.totalorder %v3425_v6, 4  ;;  %vm407_vm11 = vc.u32 %v3469_v0, %v3472_v13 }
  0xff   :  { %v408_v18 = vadd.s32 1, %v3473_v2  ;;  %v485_v48 = vor.u32 %v484_v59, %v483_v11  ;;  %v494_v50 = vsel %vm486_vm8, %v473_v42, %v476_v54  ;;  %vm488_vm12 = vcmp.lt.s32.totalorder %v3425_v6, 3 }
 0x100   :  { %2684 = vmatmul.mubr.msk.f32.vlgmr.msra.gmra.mrb[0].mxu1 %vm187_vm1, %v3386_v1  ;;  %v491_v41 = vsel %vm489_vm10, %v479_v45, 2102212464  ;;  %v495_v49 = vsel %vm489_vm10, %v482_v14, 920167782  ;;  %v498_v17 = vsel %vm486_vm8, %v476_v54, %v479_v45  ;;  %v490_v23 = vsel %vm486_vm8, %v470_v10, %v473_v42 }
 0x101   :  { %2905 = vmatpush3.bf16.msra.mxu1 %v3413_v39  ;;  %v409_v21 = vsel %vm407_vm11, %v408_v18, %v3473_v2  ;;  %v496_v24 = vsel %vm488_vm12, %v479_v45, %v495_v49  ;;  %v499_v25 = vsel %vm489_vm10, %v485_v48, 1326507024  ;;  %v492_v29 = vsel %vm488_vm12, %v476_v54, %v491_v41 }
 0x102   :  { %2907 = vmatprep.subr.bf16.mxu1 %v3415_v40  ;;  %v410_v28 = vadd.s32 %v409_v21, %v405_v9  ;;  %v497_v30 = vsel %vm487_vm9, %v494_v50, %v496_v24  ;;  %v500_v31 = vsel %vm488_vm12, %v482_v14, %v499_v25  ;;  %v3115_v3 = vunpack.i.h.bf16 %v3113_v27 }
 0x103   :  { %v501_v32 = vsel %vm487_vm9, %v498_v17, %v500_v31  ;;  %v3508_v8 = vmul.u32.u64.low %v3480_v56, %v497_v30  ;;  %v3509_v39 = vmul.u32.u64.high %v3480_v56, %v497_v30, %v3508_v8  ;;  %v3114_v38 = vunpack.i.l.bf16 %v3113_v27 }
 0x104   :  { %v411_v34 = vadd.s32 536870912, %v410_v28  ;;  %v3513_v35 = vmul.u32.u64.low %v3480_v56, %v501_v32  ;;  %v3514_v37 = vmul.u32.u64.high %v3480_v56, %v501_v32, %v3513_v35  ;;  %v493_v42 = vsel %vm487_vm9, %v490_v23, %v492_v29 }
 0x105   :  { %2909 = vmatpush3.bf16.msra.mxu1 %v3415_v40  ;;  %v2914_v46 = vpack.c.bf16 %v3110_v43, %v3109_v44  ;;  %v3120_v54 = vunpack.i.h.bf16 %v3118_v33  ;;  %v512_v60 = vadd.s32 1, %v3509_v39  ;;  %v509_v40 = vmul.u32 %v3480_v56, %v493_v42  ;;  %v3123_v56 = vpop.permute.xlu0 %3122 }
 0x106   :  { %2911 = vmatprep.subr.bf16.mxu1 %v3422_v47  ;;  %v412_v53 = vshrl.u32 %v411_v34, 30  ;;  %vm511_vm13 = vc.u32 %v3514_v37, %v3508_v8  ;;  %v2918_v6 = vpack.c.bf16 %v3115_v3, %v3114_v38  ;;  %v3119_v45 = vunpack.i.l.bf16 %v3118_v33 }
 0x107   :  { %v513_v36 = vsel %vm511_vm13, %v512_v60, %v3509_v39  ;;  %v3125_v59 = vunpack.i.h.bf16 %v3123_v56  ;;  %v3124_v12 = vunpack.i.l.bf16 %v3123_v56  ;;  %v406_v24 = vadd.s32 %v3472_v13, %v3469_v0 }
 0x108   :  { %v413_v61 = vshll.u32 %v412_v53, 30  ;;  %v436_v2 = vsub.s32 4, %v412_v53  ;;  %v514_v5 = vadd.s32 %v513_v36, %v509_v40  ;;  %v2922_v11 = vpack.c.bf16 %v3120_v54, %v3119_v45 }
 0x109   :  { %2913 = vmatpush3.bf16.msra.mxu1 %v3422_v47  ;;  %v3543_v41 = vpack.c.bf16 %v3125_v59, %v3124_v12  ;;  %v510_v0 = vadd.s32 %v3508_v8, %v3514_v37  ;;  %vm456_vm4 = vcmp.lt.s32.totalorder %v3386_v1, 0  ;;  %vm455_vm5 = vcmp.le.f32.partialorder %v454_v22, 0.7853982 }
 0x10a   :  { %2915 = vmatprep.subr.bf16.mxu1 %v2914_v46  ;;  %v414_v44 = vsub.s32 %v410_v28, %v413_v61  ;;  %v437_v52 = vsel %vm352_vm14, %v436_v2, %v412_v53  ;;  %v515_v10 = vadd.s32 536870912, %v514_v5  ;;  %vm442_vm12 = vweird.f32 %v3388_v4 }
 0x10b   :  { %v3541_v47 = vsel %vm3533_vm15, 0, %v437_v52 }
 0x10c   :  { %v416_v9 = vsub.s32 0, %v414_v44  ;;  %v516_v18 = vshrl.u32 %v515_v10, 30  ;;  %v443_v56 = vadd.s32 3, %v3541_v47  ;;  %v770_v12 = vand.u32 3, %v3541_v47 }
 0x10d   :  { %2917 = vmatpush3.bf16.msra.mxu1 %v2914_v46 }
 0x10e   :  { %2919 = vmatprep.subr.bf16.mxu1 %v2918_v6  ;;  %v2340_v14 = vmin.u32 %v416_v9, %v414_v44  ;;  %v517_v50 = vshll.u32 %v516_v18, 30  ;;  %v444_v59 = vand.u32 3, %v443_v56  ;;  %vm772_vm7 = vcmp.eq.s32.totalorder %v770_v12, 0 }
 0x10f   :  { %vm775_vm8 = vcmp.eq.s32.totalorder %v770_v12, 2  ;;  %vm771_vm11 = vcmp.lt.s32.totalorder %v770_v12, 2 }
 0x110   :  { %v418_v48 = vclz %v2340_v14  ;;  %v518_v17 = vsub.s32 %v514_v5, %v517_v50  ;;  %v540_v5 = vsub.s32 4, %v516_v18  ;;  %vm449_vm6 = vcmp.eq.s32.totalorder %v444_v59, 2 }
 0x111   :  { %2921 = vmatpush3.bf16.msra.mxu1 %v2918_v6  ;;  %vm446_vm9 = vcmp.eq.s32.totalorder %v444_v59, 0  ;;  %vm445_vm10 = vcmp.lt.s32.totalorder %v444_v59, 2 }
 0x112   :  { %2923 = vmatprep.subr.bf16.mxu1 %v2922_v11  ;;  %v2341_v49 = vadd.s32 4294967294, %v418_v48  ;;  %v520_v23 = vsub.s32 0, %v518_v17 }
 0x114   :  { %vm2342_vm2 = vcmp.lt.s32.totalorder %v2341_v49, 0  ;;  %v2344_v28 = vmin.u32 %v520_v23, %v518_v17 }
 0x115   :  { %2925 = vmatpush3.bf16.msra.mxu1 %v2922_v11  ;;  %v421_v21 = vsel %vm2342_vm2, 0, %v2341_v49  ;;  %v541_v11 = vsel %vm456_vm4, %v540_v5, %v516_v18  ;;  %vm546_vm2 = vweird.f32 %v3386_v1 }
 0x116   :  { %v422_v25 = vsub.s32 32, %v421_v21  ;;  %v426_v27 = vsub.s32 4294967266, %v421_v21  ;;  %2927 = vmatprep.subr.bf16.mxu1 %v3543_v41  ;;  %v423_v29 = vshll.u32 %v414_v44, %v421_v21  ;;  %v522_v32 = vclz %v2344_v28 }
 0x117   :  { %v543_v48 = vsel %vm455_vm5, 0, %v541_v11 }
 0x118   :  { %v424_v30 = vshrl.u32 %v406_v24, %v422_v25  ;;  %v427_v31 = vadd.s32 127, %v426_v27  ;;  %v2345_v34 = vadd.s32 4294967294, %v522_v32  ;;  %v547_v22 = vadd.s32 3, %v543_v48  ;;  %v3128_v27 = vpop.permute.xlu1 %3127 }
 0x119   :  { %v3130_v32 = vunpack.i.h.bf16 %v3128_v27  ;;  %v873_v5 = vand.u32 3, %v543_v48 }
 0x11a   :  { %v425_v39 = vor.u32 %v424_v30, %v423_v29  ;;  %v428_v33 = vshll.u32 %v427_v31, 23  ;;  %vm2346_vm3 = vcmp.lt.s32.totalorder %v2345_v34, 0  ;;  %v548_v30 = vand.u32 3, %v547_v22 }
 0x11b   :  { %v525_v42 = vsel %vm2346_vm3, 0, %v2345_v34  ;;  %vm875_vm3 = vcmp.eq.s32.totalorder %v873_v5, 0 }
 0x11c   :  { %v429_v35 = vor.u32 4788187, %v428_v33  ;;  %v432_v38 = vcvt.s32.f32 %v425_v39  ;;  %v526_v13 = vsub.s32 32, %v525_v42  ;;  %v530_v46 = vsub.s32 4294967266, %v525_v42 }
 0x11d   :  { %v527_v54 = vshll.u32 %v518_v17, %v525_v42  ;;  %v3129_v39 = vunpack.i.l.bf16 %v3128_v27  ;;  %vm553_vm13 = vcmp.eq.s32.totalorder %v548_v30, 2  ;;  %v2489_v27 = vld [vmem:[%s3821_s1 + $0x68] sm:$0xff]  }
 0x11e   :  { %v430_v3 = vand.u32 2147483647, %v429_v35  ;;  %v528_v60 = vshrl.u32 %v510_v0, %v526_v13  ;;  %v531_v61 = vadd.s32 127, %v530_v46 }
 0x11f   :  { %v2930_v42 = vpack.c.bf16 %v3130_v32, %v3129_v39 }
 0x120   :  { %v433_v53 = vmul.f32 %v432_v38, %v430_v3  ;;  %v529_v40 = vor.u32 %v528_v60, %v527_v54  ;;  %v532_v6 = vshll.u32 %v531_v61, 23  ;;  %v3133_v3 = vpop.permute.xlu0 %3132  ;;  %v3138_v54 = vpop.permute.xlu1 %3137 }
 0x121   :  { %v3135_v13 = vunpack.i.h.bf16 %v3133_v3  ;;  %v3134_v46 = vunpack.i.l.bf16 %v3133_v3  ;;  %v3140_v61 = vunpack.i.h.bf16 %v3138_v54 }
 0x122   :  { %v434_v2 = vxor.u32 2147483648, %v433_v53  ;;  %v533_v44 = vor.u32 4788187, %v532_v6  ;;  %v536_v37 = vcvt.s32.f32 %v529_v40 }
 0x123   :  { %v2934_v60 = vpack.c.bf16 %v3135_v13, %v3134_v46 }
 0x124   :  { %v435_v45 = vsel %vm352_vm14, %v434_v2, %v433_v53  ;;  %v534_v8 = vand.u32 2147483647, %v533_v44  ;;  %vm550_vm14 = vcmp.eq.s32.totalorder %v548_v30, 0  ;;  %v3139_v2 = vunpack.i.l.bf16 %v3138_v54  ;;  %v3143_v40 = vpop.permute.xlu0 %3142  ;;  %v3148_v44 = vpop.permute.xlu1 %3147 }
 0x125   :  { %v438_v36 = vsel %vm3533_vm15, %v3388_v4, %v435_v45  ;;  %vm549_vm15 = vcmp.lt.s32.totalorder %v548_v30, 2  ;;  %v3145_v45 = vunpack.i.h.bf16 %v3143_v40  ;;  %v3591_v30 = vld [vmem:[%s3821_s1 + $0x30] sm:$0xff]  }
 0x126   :  { %3211 = vcosq.f32 %v438_v36  ;;  %v537_v52 = vmul.f32 %v536_v37, %v534_v8  ;;  %v2938_v6 = vpack.c.bf16 %v3140_v61, %v3139_v2  ;;  %v3150_v37 = vunpack.i.h.bf16 %v3148_v44 }
 0x127   :  { %3213 = vsinq.f32 %v438_v36  ;;  %v3144_v36 = vunpack.i.l.bf16 %v3143_v40  ;;  %v2459_v32 = vunpack.c.l.bf16 %v3591_v30  ;;  %v2460_v39 = vunpack.c.h.bf16 %v3591_v30 }
 0x128   :  { %v538_v9 = vxor.u32 2147483648, %v537_v52  ;;  %v1030_v59 = vpop.permute.xlu1 %1029 }
 0x129   :  { %v2942_v8 = vpack.c.bf16 %v3145_v45, %v3144_v36  ;;  %v3610_v3 = vpack.i.bf16 %v2460_v39, %v2459_v32  ;;  %v1133_v36 = vld [vmem:[%s3821_s1 + $0x70] sm:$0xf] }
 0x12a   :  { %v539_v10 = vsel %vm456_vm4, %v538_v9, %v537_v52  ;;  %v3149_v52 = vunpack.i.l.bf16 %v3148_v44  ;;  %vm878_vm4 = vcmp.eq.s32.totalorder %v873_v5, 2 }
 0x12b   :  { %v542_v43 = vsel %vm455_vm5, %v3386_v1, %v539_v10  ;;  %vm874_vm5 = vcmp.lt.s32.totalorder %v873_v5, 2  ;;  %v1010_v1 = vpop.permute.xlu0 %1009  ;;  %3182 = vrot.lane.b32.xlu0 %v3610_v3, %s3275_s4 }
 0x12c   :  { %3215 = vcosq.f32 %v542_v43 }
 0x12d   :  { %3217 = vsinq.f32 %v542_v43  ;;  %v1137_v43 = vld [vmem:[%s3821_s1 + $0x68] sm:$0x1] }
 0x12e   :  { %v1138_v12 = vunpack.c.l.bf16 %v1137_v43 }
 0x130   :  { %v3212_v14 = vpop.eup %3211  ;;  %1140 = vrot.lane.b32.xlu1 %v1138_v12, %s3272_s17 }
 0x131   :  { %v3214_v50 = vpop.eup %3213  ;;  %v450_v49 = vxor.u32 2147483648, %v3212_v14 }
 0x132   :  { %v447_v17 = vxor.u32 2147483648, %v3214_v50 }
 0x133   :  { %v451_v21 = vsel %vm449_vm6, %v450_v49, %v3214_v50  ;;  %v777_v23 = vsel %vm775_vm8, %v450_v49, %v3214_v50  ;;  %vm1041_vm6 = vcmask 1043456   ;;  %vm1142_vm8 = vcmask 15360  }
 0x134   :  { %v448_v18 = vsel %vm446_vm9, %v3212_v14, %v447_v17  ;;  %v774_v24 = vsel %vm772_vm7, %v3212_v14, %v447_v17  ;;  %2740 = vmatprep.subr.msk.mxu0 %vm1041_vm6, %v1030_v59  ;;  %vm1149_vm7 = vcmask 1041408   ;;  %3157 = vrot.lane.b32.xlu1 %v3348_v20, %s3273_s22  ;;  %vm1227_vm9 = vcmask 195584  }
 0x135   :  { %v452_v47 = vsel %vm445_vm10, %v448_v18, %v451_v21  ;;  %v778_v25 = vsel %vm771_vm11, %v774_v24, %v777_v23  ;;  %2741 = vmatpush3.msk.msra.mxu0 %vm1041_vm6, %v1030_v59  ;;  %vm1358_vm10 = vcmask 424960  }
 0x136   :  { %v453_v28 = vsel %vm442_vm12, nan, %v452_v47  ;;  %v779_v29 = vsel %vm442_vm12, nan, %v778_v25  ;;  %v3216_v31 = vpop.eup %3215 }
 0x137   :  { %2710 = vmatprep.mubr.msk.f32.mxu1 %vm187_vm1, %v453_v28  ;;  %v3218_v33 = vpop.eup %3217  ;;  %v554_v34 = vxor.u32 2147483648, %v3216_v31  ;;  %v1321_v28 = vld [vmem:[%s3821_s1 + $0x18] sm:$0x3] }
 0x138   :  { %v551_v35 = vxor.u32 2147483648, %v3218_v33 }
 0x139   :  { %v555_v38 = vsel %vm553_vm13, %v554_v34, %v3218_v33  ;;  %v880_v9 = vsel %vm878_vm4, %v554_v34, %v3218_v33 }
 0x13a   :  { %v552_v4 = vsel %vm550_vm14, %v3216_v31, %v551_v35  ;;  %v877_v56 = vsel %vm875_vm3, %v3216_v31, %v551_v35  ;;  %v3596_v31 = vld [vmem:[%s3821_s1 + $0x38] sm:$0xff]   ;;  %v3607_v35 = vld [vmem:[%s3821_s1 + $0x40] sm:$0xff]  }
 0x13b   :  { %v556_v0 = vsel %vm549_vm15, %v552_v4, %v555_v38  ;;  %v881_v10 = vsel %vm874_vm5, %v877_v56, %v880_v9  ;;  %v2463_v33 = vunpack.c.l.bf16 %v3596_v31  ;;  %v2464_v34 = vunpack.c.h.bf16 %v3596_v31  ;;  %v3259_v9 = vld [vmem:[%s3822_s0] sm:$0xff] }
 0x13c   :  { %v557_v53 = vsel %vm546_vm2, nan, %v556_v0  ;;  %v882_v11 = vsel %vm546_vm2, nan, %v881_v10  ;;  %v2468_v38 = vunpack.c.h.bf16 %v3607_v35  ;;  %v1032_v0 = vpop.permute.xlu0 %1031 }
 0x13d   :  { %2711 = vmatmul.mubr.msk.f32.vlgmr.msra.gmra.mrb[0].mxu1 %vm187_vm1, %v557_v53  ;;  %v3612_v15 = vpack.i.bf16 %v2464_v34, %v2463_v33 }
 0x13e   :  { %2929 = vmatpush3.bf16.msra.mxu1 %v3543_v41  ;;  %2737 = vmatprep.mubr.msk.f32.mxu1 %vm187_vm1, %v779_v29  ;;  %v2946_v41 = vpack.c.bf16 %v3150_v37, %v3149_v52  ;;  %v1328_v29 = vunpack.c.l.bf16 %v1321_v28  ;;  %v1136_v37 = vunpack.c.l.bf16 %v1133_v36 }
 0x13f   :  { %2931 = vmatprep.subr.bf16.mxu1 %v2930_v42 }
 0x140   :  { %1350 = vrot.lane.b32.xlu1 %v1328_v29, %s3273_s22  ;;  %v3153_v44 = vpop.permute.xlu0 %3152 }
 0x141   :  { %v3155_v52 = vunpack.i.h.bf16 %v3153_v44  ;;  %v3154_v5 = vunpack.i.l.bf16 %v3153_v44 }
 0x142   :  { %2933 = vmatpush3.bf16.msra.mxu1 %v2930_v42  ;;  %v1759_v42 = vld [vmem:[%s3821_s1 + $0x48] sm:$0x3] }
 0x143   :  { %2935 = vmatprep.subr.bf16.mxu1 %v2934_v60  ;;  %v3623_v19 = vunpack.c.l.bf16 %v1759_v42  ;;  %v2954_v10 = vpack.c.bf16 %v3155_v52, %v3154_v5 }
 0x144   :  { %3172 = vrot.lane.b32.xlu1 %v3348_v20, %s3274_s27  ;;  %v2467_v20 = vunpack.c.l.bf16 %v3607_v35  ;;  %v3163_v43 = vpop.permute.xlu0 %3162 }
 0x146   :  { %2937 = vmatpush3.bf16.msra.mxu1 %v2934_v60  ;;  %v3621_v4 = vpack.i.bf16 %v2468_v38, %v2467_v20 }
 0x147   :  { %2939 = vmatprep.subr.bf16.mxu1 %v2938_v6 }
 0x148   :  { %1454 = vrot.lane.b32.xlu1 %v1328_v29, %s3274_s27  ;;  %3192 = vrot.lane.b32.xlu0 %v3621_v4, %s3275_s4 }
 0x14a   :  { %2941 = vmatpush3.bf16.msra.mxu1 %v2938_v6 }
 0x14b   :  { %2943 = vmatprep.subr.bf16.mxu1 %v2942_v8 }
 0x14c   :  { %3187 = vrot.lane.b32.xlu1 %v3612_v15, %s3275_s4 }
 0x14e   :  { %2945 = vmatpush3.bf16.msra.mxu1 %v2942_v8 }
 0x14f   :  { %2947 = vmatprep.subr.bf16.mxu1 %v2946_v41 }
 0x150   :  { %2077 = vrot.lane.b32.xlu1 %v3623_v19, %s3275_s4 }
 0x152   :  { %2949 = vmatpush3.bf16.msra.mxu1 %v2946_v41 }
 0x154   :  { %3197 = vrot.lane.b32.xlu1 %v3610_v3, %s3276_s10 }
 0x155   :  { %2738 = vmatmul.mubr.msk.f32.vlgmr.msra.gmra.mrb[0].mxu1 %vm187_vm1, %v882_v11  ;;  %vm1034_vm1 = vcmask 31744  }
 0x158   :  { %3207 = vrot.lane.b32.xlu1 %v3621_v4, %s3276_s10 }
 0x1a2   :  { %v1141_v25 = vpop.permute.xlu1 %1140 }
 0x1a3   :  { %2745 = vmatprep.subr.msk.mxu0 %vm1149_vm7, %v1141_v25 }
 0x1a6   :  { %v3158_v56 = vpop.permute.xlu1 %3157 }
 0x1a7   :  { %v3160_v11 = vunpack.i.h.bf16 %v3158_v56  ;;  %v3159_v59 = vunpack.i.l.bf16 %v3158_v56 }
 0x1a9   :  { %v2958_v12 = vpack.c.bf16 %v3160_v11, %v3159_v59 }
 0x228   :  { %v2739_v14 = vpop.f32.mrb[0].mxu1 }
 0x229   :  { %v1013_v48 = vadd.f32 %v2739_v14, %v1010_v1  ;;  %v991_v50 = vpop.f32.mrb[1].mxu1  ;;  %v3164_v14 = vunpack.i.l.bf16 %v3163_v43 }
 0x22a   :  { %v1012_v49 = vadd.f32 %v1010_v1, %v991_v50  ;;  %v3165_v1 = vunpack.i.h.bf16 %v3163_v43  ;;  %v1307_v50 = vld [vmem:[%s3821_s1 + $0x80] sm:$0x1] }
 0x22b   :  { %v2360_v17 = vmul.f32 -1.442695, %v1013_v48 }
 0x22c   :  { %v2359_v21 = vmul.f32 -1.442695, %v1012_v49  ;;  %v2962_v48 = vpack.c.bf16 %v3165_v1, %v3164_v14  ;;  %v1308_v49 = vunpack.c.l.bf16 %v1307_v50 }
 0x22d   :  { %3219 = vpow2.f32 %v2360_v17 }
 0x22e   :  { %3221 = vpow2.f32 %v2359_v21  ;;  %v1312_v17 = vrot.slane %v1308_v49, %v3379_v58  ;;  %v1351_v21 = vpop.permute.xlu1 %1350 }
 0x230   :  { %2171 = vrot.lane.b32.xlu0 %v1312_v17, %s3272_s17 }
 0x234   :  { %3202 = vrot.lane.b32.xlu0 %v3612_v15, %s3276_s10 }
 0x237   :  { %v3220_v22 = vpop.eup %3219 }
 0x238   :  { %v3222_v23 = vpop.eup %3221  ;;  %v1021_v18 = vadd.f32 1.0, %v3220_v22  ;;  %v3168_v22 = vpop.permute.xlu0 %3167 }
 0x239   :  { %v1020_v24 = vadd.f32 1.0, %v3222_v23  ;;  %v3170_v23 = vunpack.i.h.bf16 %v3168_v22 }
 0x23b   :  { %3223 = vrcp.f32 %v1020_v24  ;;  %v3173_v24 = vpop.permute.xlu1 %3172 }
 0x23c   :  { %3225 = vrcp.f32 %v1021_v18  ;;  %v3169_v18 = vunpack.i.l.bf16 %v3168_v22  ;;  %v3178_v32 = vpop.permute.xlu0 %3177 }
 0x23d   :  { %v3180_v4 = vunpack.i.h.bf16 %v3178_v32 }
 0x23f   :  { %v1455_v56 = vpop.permute.xlu1 %1454 }
 0x245   :  { %v3224_v62 = vpop.eup %3223 }
 0x246   :  { %v3226_v47 = vpop.eup %3225  ;;  %2742 = vmatprep.mubr.msk.f32.mxu0 %vm1034_vm1, %v3224_v62 }
 0x247   :  { %2743 = vmatmul.mubr.msk.f32.vlgmr.msra.gmra.mrb[2].mxu0 %vm1034_vm1, %v3226_v47  ;;  %v3175_v47 = vunpack.i.h.bf16 %v3173_v24 }
 0x248   :  { %2746 = vmatpush3.msk.msra.mxu0 %vm1149_vm7, %v1141_v25  ;;  %v3174_v25 = vunpack.i.l.bf16 %v3173_v24 }
 0x249   :  { %2951 = vmatprep.subr.bf16.mxu0 %v2489_v27 }
 0x24a   :  { %v2970_v3 = vpack.c.bf16 %v3175_v47, %v3174_v25 }
 0x31a   :  { %v2744_v13 = vpop.f32.mrb[2].mxu0 }
 0x31b   :  { %v1116_v46 = vadd.f32 %v2744_v13, %v1032_v0  ;;  %v1110_v53 = vpop.f32.mrb[3].mxu0 }
 0x31c   :  { %v1111_v54 = vadd.f32 %v1110_v53, %v1032_v0  ;;  %v3179_v0 = vunpack.i.l.bf16 %v3178_v32 }
 0x31d   :  { %v2365_v60 = vmul.f32 -1.442695, %v1116_v46 }
 0x31e   :  { %v2364_v61 = vmul.f32 -1.442695, %v1111_v54  ;;  %v3183_v54 = vpop.permute.xlu0 %3182 }
 0x31f   :  { %3227 = vpow2.f32 %v2365_v60  ;;  %v3184_v36 = vunpack.i.l.bf16 %v3183_v54 }
 0x320   :  { %3229 = vpow2.f32 %v2364_v61 }
 0x329   :  { %v3228_v2 = vpop.eup %3227 }
 0x32a   :  { %v3230_v40 = vpop.eup %3229  ;;  %v1126_v6 = vadd.f32 1.0, %v3228_v2 }
 0x32b   :  { %v1125_v45 = vadd.f32 1.0, %v3230_v40  ;;  %v2974_v40 = vpack.c.bf16 %v3180_v4, %v3179_v0 }
 0x32d   :  { %3231 = vrcp.f32 %v1125_v45  ;;  %v3185_v45 = vunpack.i.h.bf16 %v3183_v54 }
 0x32e   :  { %3233 = vrcp.f32 %v1126_v6 }
 0x337   :  { %v3232_v8 = vpop.eup %3231 }
 0x338   :  { %v3234_v41 = vpop.eup %3233  ;;  %2747 = vmatprep.mubr.msk.f32.mxu0 %vm1142_vm8, %v3232_v8 }
 0x339   :  { %2748 = vmatmul.mubr.msk.f32.vlgmr.msra.gmra.mrb[4].mxu0 %vm1142_vm8, %v3234_v41 }
 0x33a   :  { %2953 = vmatpush3.bf16.msra.mxu0 %v2489_v27  ;;  %2756 = vmatprep.mubr.msk.f32.mxu0 %vm1227_vm9, %v3259_v9  ;;  %v3671_v9 = vpack.c.bf16 %v3185_v45, %v3184_v36 }
 0x33b   :  { %2754 = vmatprep.subr.mxu0 %v1136_v37 }
 0x33e   :  { %2755 = vmatpush3.msra.mxu0 %v1136_v37 }
 0x33f   :  { %2955 = vmatprep.subr.bf16.mxu0 %v2954_v10 }
 0x341   :  { %2757 = vmatmul.mubr.msk.f32.vlgmr.msra.gmra.mrb[4].mxu0 %vm1227_vm9, %v3358_v26  ;;  %v2966_v26 = vpack.c.bf16 %v3170_v23, %v3169_v18 }
 0x342   :  { %2957 = vmatpush3.bf16.msra.mxu0 %v2954_v10 }
 0x343   :  { %2959 = vmatprep.subr.bf16.mxu0 %v2958_v12 }
 0x346   :  { %2961 = vmatpush3.bf16.msra.mxu0 %v2958_v12 }
 0x347   :  { %2963 = vmatprep.subr.bf16.mxu0 %v2962_v48 }
 0x34a   :  { %2965 = vmatpush3.bf16.msra.mxu0 %v2962_v48 }
 0x34b   :  { %2771 = vmatprep.subr.msk.mxu0 %vm1041_vm6, %v1351_v21 }
 0x34e   :  { %2772 = vmatpush3.msk.msra.mxu0 %vm1041_vm6, %v1351_v21 }
 0x34f   :  { %2967 = vmatprep.subr.bf16.mxu0 %v2966_v26 }
 0x414   :  { %v2758_v62 = vpop.f32.mrb[4].mxu0 }
 0x415   :  { %v3649_v27 = vadd.f32 %v2758_v62, %v1312_v17  ;;  %v1298_v28 = vpop.f32.mrb[5].mxu0 }
 0x416   :  { %v3651_v29 = vadd.f32 %v1312_v17, %v1298_v28 }
 0x417   :  { %v1652_v39 = vand.u32 2139095040, %v3649_v27  ;;  %v1649_v33 = vand.u32 2147483647, %v3649_v27  ;;  %v1330_v42 = vmul.f32 %v3649_v27, %v3649_v27 }
 0x418   :  { %v1548_v34 = vand.u32 2139095040, %v3651_v29  ;;  %v1329_v15 = vmul.f32 %v3651_v29, %v3651_v29  ;;  %v1545_v20 = vand.u32 2147483647, %v3651_v29 }
 0x419   :  { %v1653_v38 = vshrl.u32 %v1652_v39, 23  ;;  %v1656_v46 = vand.u32 8388607, %v1649_v33 }
 0x41a   :  { %v1549_v13 = vshrl.u32 %v1548_v34, 23  ;;  %2773 = vmatprep.mubr.msk.f32.mxu0 %vm1358_vm10, %v1329_v15  ;;  %v1552_v60 = vand.u32 8388607, %v1545_v20 }
 0x41b   :  { %v2381_v53 = vadd.s32 4294967169, %v1653_v38  ;;  %2774 = vmatmul.mubr.msk.f32.vlgmr.msra.gmra.mrb[6].mxu0 %vm1358_vm10, %v1330_v42  ;;  %v1657_v44 = vor.u32 8388608, %v1656_v46 }
 0x41c   :  { %v2377_v61 = vadd.s32 4294967169, %v1549_v13  ;;  %2969 = vmatpush3.bf16.msra.mxu0 %v2966_v26  ;;  %2790 = vmatprep.mubr.msk.f32.mxu0 %vm1358_vm10, %v3651_v29  ;;  %v1553_v8 = vor.u32 8388608, %v1552_v60 }
 0x41d   :  { %v1659_v2 = vadd.s32 1, %v2381_v53  ;;  %2971 = vmatprep.subr.bf16.mxu0 %v2970_v3  ;;  %v3673_v10 = vshll.u32 %v1657_v44, 8 }
 0x41e   :  { %v1555_v6 = vadd.s32 1, %v2377_v61  ;;  %v3678_v12 = vshll.u32 %v1553_v8, 8 }
 0x41f   :  { %vm1660_vm11 = vcmp.gt.s32.totalorder %v1659_v2, 0 }
 0x420   :  { %v1661_v37 = vsel %vm1660_vm11, %v1659_v2, 0  ;;  %vm1556_vm12 = vcmp.gt.s32.totalorder %v1555_v6, 0  ;;  %2973 = vmatpush3.bf16.msra.mxu0 %v2970_v3  ;;  %vm1547_vm11 = vcmp.lt.s32.totalorder %v3651_v29, 0 }
 0x421   :  { %v3669_v52 = vand.u32 31, %v1661_v37  ;;  %v1557_v5 = vsel %vm1556_vm12, %v1555_v6, 0  ;;  %2975 = vmatprep.subr.bf16.mxu0 %v2974_v40  ;;  %v3675_v11 = vshrl.u32 %v1661_v37, 5  ;;  %vm3773_vm12 = vcmp.le.f32.partialorder %v1545_v20, 0.7853982 }
 0x422   :  { %v1559_v41 = vand.u32 31, %v1557_v5  ;;  %v1558_v43 = vshrl.u32 %v1557_v5, 5 }
 0x423   :  { %v1664_v59 = vsub.s32 32, %v3669_v52  ;;  %v1666_v14 = vshll.u32 %v3265_v51, %v3669_v52  ;;  %v1669_v48 = vshll.u32 %v3266_v55, %v3669_v52  ;;  %v1672_v50 = vshll.u32 %v3267_v57, %v3669_v52 }
 0x424   :  { %v1560_v1 = vsub.s32 32, %v1559_v41  ;;  %2977 = vmatpush3.bf16.msra.mxu0 %v2974_v40  ;;  %v1562_v49 = vshll.u32 %v3265_v51, %v1559_v41  ;;  %v1565_v17 = vshll.u32 %v3266_v55, %v1559_v41  ;;  %v1568_v21 = vshll.u32 %v3267_v57, %v1559_v41 }
 0x425   :  { %2788 = vmatprep.subr.msk.mxu0 %vm1041_vm6, %v1455_v56  ;;  %v1571_v22 = vshll.u32 %v3268_v63, %v1559_v41  ;;  %v1574_v24 = vshll.u32 %v3269_v7, %v1559_v41  ;;  %vm1577_vm13 = vcmp.lt.s32.totalorder %v1558_v43, 1  ;;  %vm1579_vm14 = vcmp.lt.s32.totalorder %v1558_v43, 3 }
 0x426   :  { %v1563_v23 = vshrl.u32 %v3266_v55, %v1560_v1  ;;  %v1566_v18 = vshrl.u32 %v3267_v57, %v1560_v1  ;;  %v1569_v26 = vshrl.u32 %v3268_v63, %v1560_v1  ;;  %v1561_v62 = vshrl.u32 %v3265_v51, %v1560_v1 }
 0x427   :  { %v1572_v47 = vshrl.u32 %v3269_v7, %v1560_v1  ;;  %v1575_v25 = vshrl.u32 %v3270_v16, %v1560_v1  ;;  %vm1580_vm15 = vcmp.lt.s32.totalorder %v1558_v43, 4  ;;  %v1667_v15 = vshrl.u32 %v3266_v55, %v1664_v59 }
 0x428   :  { %2789 = vmatpush3.msk.msra.mxu0 %vm1041_vm6, %v1455_v56  ;;  %v1564_v28 = vor.u32 %v1563_v23, %v1562_v49  ;;  %v1567_v32 = vor.u32 %v1566_v18, %v1565_v17  ;;  %v1570_v39 = vor.u32 %v1569_v26, %v1568_v21  ;;  %vm1578_vm2 = vcmp.lt.s32.totalorder %v1558_v43, 2 }
 0x429   :  { %2791 = vmatmul.mubr.msk.f32.vlgmr.msra.gmra.mrb[6].mxu0 %vm1358_vm10, %v3649_v27  ;;  %2979 = vmatprep.subr.bf16.mxu0 %v3591_v30  ;;  %v1573_v34 = vor.u32 %v1572_v47, %v1571_v22  ;;  %v1576_v3 = vor.u32 %v1575_v25, %v1574_v24  ;;  %v1668_v60 = vor.u32 %v1667_v15, %v1666_v14  ;;  %vm1681_vm3 = vcmp.lt.s32.totalorder %v3675_v11, 1 }
 0x42a   :  { %2981 = vmatpush3.bf16.msra.mxu0 %v3591_v30  ;;  %v1581_v38 = vsel %vm1577_vm13, %v1561_v62, %v1564_v28  ;;  %v1582_v42 = vsel %vm1580_vm15, %v1570_v39, 2102212464  ;;  %v1585_v4 = vsel %vm1577_vm13, %v1564_v28, %v1567_v32  ;;  %v1589_v0 = vsel %vm1577_vm13, %v1567_v32, %v1570_v39 }
 0x42b   :  { %2983 = vmatprep.subr.bf16.mxu0 %v3596_v31  ;;  %v1583_v13 = vsel %vm1579_vm14, %v1567_v32, %v1582_v42  ;;  %v1586_v46 = vsel %vm1580_vm15, %v1573_v34, 920167782  ;;  %v1590_v53 = vsel %vm1580_vm15, %v1576_v3, 1326507024  ;;  %v1670_v30 = vshrl.u32 %v3267_v57, %v1664_v59 }
 0x42c   :  { %v1587_v54 = vsel %vm1579_vm14, %v1570_v39, %v1586_v46  ;;  %v1591_v55 = vsel %vm1579_vm14, %v1573_v34, %v1590_v53  ;;  %v1584_v61 = vsel %vm1578_vm2, %v1581_v38, %v1583_v13  ;;  %v1673_v6 = vshrl.u32 %v3268_v63, %v1664_v59 }
 0x42d   :  { %v1588_v2 = vsel %vm1578_vm2, %v1585_v4, %v1587_v54  ;;  %v1592_v40 = vsel %vm1578_vm2, %v1589_v0, %v1591_v55  ;;  %v1671_v37 = vor.u32 %v1670_v30, %v1669_v48  ;;  %v1675_v5 = vshll.u32 %v3268_v63, %v3669_v52 }
 0x42e   :  { %2985 = vmatpush3.bf16.msra.mxu0 %v3596_v31  ;;  %v3715_v45 = vmul.u32.u64.low %v3678_v12, %v1592_v40  ;;  %v3716_v36 = vmul.u32.u64.high %v3678_v12, %v1592_v40, %v3715_v45  ;;  %v3719_v44 = vmul.u32.u64.low %v3678_v12, %v1588_v2  ;;  %v3720_v8 = vmul.u32.u64.high %v3678_v12, %v1588_v2, %v3719_v44 }
 0x42f   :  { %2987 = vmatprep.subr.bf16.mxu0 %v3607_v35  ;;  %v1674_v57 = vor.u32 %v1673_v6, %v1672_v50  ;;  %v1676_v41 = vshrl.u32 %v3269_v7, %v1664_v59  ;;  %v1665_v31 = vshrl.u32 %v3265_v51, %v1664_v59  ;;  %v1678_v56 = vshll.u32 %v3269_v7, %v3669_v52 }
 0x430   :  { %v1679_v43 = vshrl.u32 %v3270_v16, %v1664_v59  ;;  %v1600_v1 = vmul.u32 %v3678_v12, %v1584_v61  ;;  %vm1682_vm4 = vcmp.lt.s32.totalorder %v3675_v11, 2  ;;  %vm1684_vm5 = vcmp.lt.s32.totalorder %v3675_v11, 4 }
 0x431   :  { %v1677_v14 = vor.u32 %v1676_v41, %v1675_v5  ;;  %vm1602_vm1 = vc.u32 %v3716_v36, %v3719_v44  ;;  %v1603_v51 = vadd.s32 1, %v3720_v8  ;;  %v1689_v7 = vsel %vm1681_vm3, %v1668_v60, %v1671_v37 }
 0x432   :  { %2989 = vmatpush3.bf16.msra.mxu0 %v3607_v35  ;;  %v1680_v63 = vor.u32 %v1679_v43, %v1678_v56  ;;  %vm1683_vm7 = vcmp.lt.s32.totalorder %v3675_v11, 3  ;;  %v1686_v16 = vsel %vm1684_vm5, %v1674_v57, 2102212464  ;;  %v1693_v59 = vsel %vm1681_vm3, %v1671_v37, %v1674_v57 }
 0x433   :  { %2805 = vmatprep.subr.msk.mxu0 %vm1041_vm6, %v3623_v19  ;;  %v1690_v52 = vsel %vm1684_vm5, %v1677_v14, 920167782  ;;  %v1604_v35 = vsel %vm1602_vm1, %v1603_v51, %v3720_v8  ;;  %v1685_v12 = vsel %vm1681_vm3, %v1665_v31, %v1668_v60  ;;  %v1687_v17 = vsel %vm1683_vm7, %v1671_v37, %v1686_v16 }
 0x434   :  { %v1691_v48 = vsel %vm1683_vm7, %v1674_v57, %v1690_v52  ;;  %v1694_v50 = vsel %vm1684_vm5, %v1680_v63, 1326507024  ;;  %v1605_v49 = vadd.s32 %v1604_v35, %v1600_v1  ;;  %v1688_v25 = vsel %vm1682_vm4, %v1685_v12, %v1687_v17 }
 0x435   :  { %v1692_v21 = vsel %vm1682_vm4, %v1689_v7, %v1691_v48  ;;  %v1695_v22 = vsel %vm1683_vm7, %v1677_v14, %v1694_v50  ;;  %v1704_v34 = vmul.u32 %v3673_v10, %v1688_v25  ;;  %v1601_v61 = vadd.s32 %v3719_v44, %v3716_v36 }
 0x436   :  { %2806 = vmatpush3.msk.msra.mxu0 %vm1041_vm6, %v3623_v19  ;;  %v1696_v23 = vsel %vm1682_vm4, %v1693_v59, %v1695_v22  ;;  %v3756_v18 = vmul.u32.u64.low %v3673_v10, %v1692_v21  ;;  %v3757_v26 = vmul.u32.u64.high %v3673_v10, %v1692_v21, %v3756_v18  ;;  %v1606_v24 = vadd.s32 536870912, %v1605_v49 }
 0x437   :  { %2991 = vmatprep.subr.bf16.mxu0 %v3671_v9  ;;  %v3761_v62 = vmul.u32.u64.low %v3673_v10, %v1696_v23  ;;  %v3762_v47 = vmul.u32.u64.high %v3673_v10, %v1696_v23, %v3761_v62  ;;  %vm1651_vm15 = vcmp.lt.s32.totalorder %v3649_v27, 0  ;;  %vm1650_vm2 = vcmp.le.f32.partialorder %v1649_v33, 0.7853982 }
 0x438   :  { %v1607_v28 = vshrl.u32 %v1606_v24, 30  ;;  %v1707_v19 = vadd.s32 1, %v3757_v26 }
 0x439   :  { %vm1706_vm8 = vc.u32 %v3762_v47, %v3756_v18  ;;  %v1705_v51 = vadd.s32 %v3756_v18, %v3762_v47 }
 0x43a   :  { %v1608_v32 = vshll.u32 %v1607_v28, 30  ;;  %v1631_v39 = vsub.s32 4, %v1607_v28  ;;  %v1708_v3 = vsel %vm1706_vm8, %v1707_v19, %v3757_v26 }
 0x43b   :  { %v1709_v42 = vadd.s32 %v1708_v3, %v1704_v34 }
 0x43c   :  { %v1609_v11 = vsub.s32 %v1605_v49, %v1608_v32  ;;  %v1632_v38 = vsel %vm1547_vm11, %v1631_v39, %v1607_v28 }
 0x43d   :  { %v1634_v10 = vsel %vm3773_vm12, 0, %v1632_v38  ;;  %v1710_v0 = vadd.s32 536870912, %v1709_v42 }
 0x43e   :  { %v1611_v4 = vsub.s32 0, %v1609_v11  ;;  %v1638_v18 = vadd.s32 3, %v1634_v10  ;;  %v1946_v28 = vand.u32 3, %v1634_v10 }
 0x43f   :  { %v1711_v46 = vshrl.u32 %v1710_v0, 30  ;;  %v3188_v0 = vpop.permute.xlu1 %3187 }
 0x440   :  { %v2378_v13 = vmin.u32 %v1611_v4, %v1609_v11  ;;  %v1639_v47 = vand.u32 3, %v1638_v18  ;;  %vm1948_vm4 = vcmp.eq.s32.totalorder %v1946_v28, 0  ;;  %vm1951_vm5 = vcmp.eq.s32.totalorder %v1946_v28, 2 }
 0x441   :  { %v1712_v54 = vshll.u32 %v1711_v46, 30  ;;  %v1735_v23 = vsub.s32 4, %v1711_v46  ;;  %vm1947_vm8 = vcmp.lt.s32.totalorder %v1946_v28, 2 }
 0x442   :  { %v1613_v53 = vclz %v2378_v13  ;;  %vm1644_vm3 = vcmp.eq.s32.totalorder %v1639_v47, 2  ;;  %vm1641_vm1 = vcmp.eq.s32.totalorder %v1639_v47, 0  ;;  %vm1640_vm7 = vcmp.lt.s32.totalorder %v1639_v47, 2 }
 0x443   :  { %v1713_v60 = vsub.s32 %v1709_v42, %v1712_v54  ;;  %v1736_v62 = vsel %vm1651_vm15, %v1735_v23, %v1711_v46 }
 0x444   :  { %v2379_v55 = vadd.s32 4294967294, %v1613_v53  ;;  %v1738_v32 = vsel %vm1650_vm2, 0, %v1736_v62 }
 0x445   :  { %v1715_v30 = vsub.s32 0, %v1713_v60 }
 0x446   :  { %vm2380_vm13 = vcmp.lt.s32.totalorder %v2379_v55, 0 }
 0x447   :  { %v1616_v20 = vsel %vm2380_vm13, 0, %v2379_v55  ;;  %v2382_v6 = vmin.u32 %v1715_v30, %v1713_v60  ;;  %v3190_v55 = vunpack.i.h.bf16 %v3188_v0 }
 0x448   :  { %v1617_v2 = vsub.s32 32, %v1616_v20  ;;  %v1621_v40 = vsub.s32 4294967266, %v1616_v20  ;;  %v1618_v45 = vshll.u32 %v1609_v11, %v1616_v20  ;;  %v1742_v11 = vadd.s32 3, %v1738_v32 }
 0x449   :  { %v1717_v57 = vclz %v2382_v6 }
 0x44a   :  { %v1619_v8 = vshrl.u32 %v1601_v61, %v1617_v2  ;;  %v1622_v37 = vadd.s32 127, %v1621_v40  ;;  %v1743_v53 = vand.u32 3, %v1742_v11  ;;  %v3193_v2 = vpop.permute.xlu0 %3192 }
 0x44b   :  { %v2383_v31 = vadd.s32 4294967294, %v1717_v57 }
 0x44c   :  { %v1620_v5 = vor.u32 %v1619_v8, %v1618_v45  ;;  %v1623_v41 = vshll.u32 %v1622_v37, 23  ;;  %vm1745_vm13 = vcmp.eq.s32.totalorder %v1743_v53, 0  ;;  %v3195_v8 = vunpack.i.h.bf16 %v3193_v2 }
 0x44d   :  { %vm2384_vm14 = vcmp.lt.s32.totalorder %v2383_v31, 0  ;;  %v3194_v37 = vunpack.i.l.bf16 %v3193_v2 }
 0x44e   :  { %v1624_v56 = vor.u32 4788187, %v1623_v41  ;;  %v1627_v1 = vcvt.s32.f32 %v1620_v5  ;;  %v1720_v14 = vsel %vm2384_vm14, 0, %v2383_v31  ;;  %vm1744_vm14 = vcmp.lt.s32.totalorder %v1743_v53, 2  ;;  %v2078_v31 = vpop.permute.xlu1 %2077 }
 0x44f   :  { %v1721_v63 = vsub.s32 32, %v1720_v14  ;;  %v1725_v7 = vsub.s32 4294967266, %v1720_v14  ;;  %v1722_v44 = vshll.u32 %v1713_v60, %v1720_v14  ;;  %v3189_v60 = vunpack.i.l.bf16 %v3188_v0  ;;  %v2172_v14 = vpop.permute.xlu0 %2171 }
 0x450   :  { %v1625_v43 = vand.u32 2147483647, %v1624_v56  ;;  %v2998_v5 = vpack.c.bf16 %v3195_v8, %v3194_v37  ;;  %v2049_v41 = vand.u32 3, %v1738_v32 }
 0x451   :  { %v1723_v16 = vshrl.u32 %v1705_v51, %v1721_v63  ;;  %v1726_v52 = vadd.s32 127, %v1725_v7  ;;  %v2994_v6 = vpack.c.bf16 %v3190_v55, %v3189_v60 }
 0x452   :  { %v1628_v36 = vmul.f32 %v1627_v1, %v1625_v43  ;;  %v3198_v51 = vpop.permute.xlu1 %3197 }
 0x453   :  { %v1724_v35 = vor.u32 %v1723_v16, %v1722_v44  ;;  %v1727_v12 = vshll.u32 %v1726_v52, 23  ;;  %v3200_v63 = vunpack.i.h.bf16 %v3198_v51  ;;  %v3199_v7 = vunpack.i.l.bf16 %v3198_v51  ;;  %v3203_v44 = vpop.permute.xlu0 %3202 }
 0x454   :  { %v1629_v59 = vxor.u32 2147483648, %v1628_v36  ;;  %v3205_v16 = vunpack.i.h.bf16 %v3203_v44  ;;  %v3204_v52 = vunpack.i.l.bf16 %v3203_v44 }
 0x455   :  { %v1728_v49 = vor.u32 4788187, %v1727_v12  ;;  %v1731_v21 = vcvt.s32.f32 %v1724_v35 }
 0x456   :  { %v1630_v48 = vsel %vm1547_vm11, %v1629_v59, %v1628_v36  ;;  %vm1637_vm11 = vweird.f32 %v3651_v29  ;;  %v3002_v36 = vpack.c.bf16 %v3200_v63, %v3199_v7  ;;  %v3208_v59 = vpop.permute.xlu1 %3207 }
 0x457   :  { %v1633_v50 = vsel %vm3773_vm12, %v3651_v29, %v1630_v48  ;;  %v1729_v17 = vand.u32 2147483647, %v1728_v49  ;;  %vm1748_vm12 = vcmp.eq.s32.totalorder %v1743_v53, 2  ;;  %v3210_v35 = vunpack.i.h.bf16 %v3208_v59 }
 0x458   :  { %3235 = vcosq.f32 %v1633_v50  ;;  %v3209_v12 = vunpack.i.l.bf16 %v3208_v59  ;;  %v3006_v48 = vpack.c.bf16 %v3205_v16, %v3204_v52 }
 0x459   :  { %3237 = vsinq.f32 %v1633_v50  ;;  %v1732_v22 = vmul.f32 %v1731_v21, %v1729_v17 }
 0x45a   :  { %v3010_v50 = vpack.c.bf16 %v3210_v35, %v3209_v12 }
 0x45b   :  { %v1733_v26 = vxor.u32 2147483648, %v1732_v22 }
 0x45d   :  { %v1734_v24 = vsel %vm1651_vm15, %v1733_v26, %v1732_v22  ;;  %vm1741_vm15 = vweird.f32 %v3649_v27 }
 0x45e   :  { %v1737_v25 = vsel %vm1650_vm2, %v3649_v27, %v1734_v24  ;;  %vm2051_vm2 = vcmp.eq.s32.totalorder %v2049_v41, 0  ;;  %v2200_v27 = vld [vmem:[%s3821_s1 + $0x50] sm:$0x1] }
 0x45f   :  { %3239 = vcosq.f32 %v1737_v25  ;;  %v2201_v49 = vunpack.c.l.bf16 %v2200_v27 }
 0x460   :  { %3241 = vsinq.f32 %v1737_v25 }
 0x461   :  { %v2205_v17 = vrot.slane %v2201_v49, %v3379_v58 }
 0x462   :  { %v3236_v19 = vpop.eup %3235 }
 0x463   :  { %v3238_v39 = vpop.eup %3237  ;;  %v1645_v34 = vxor.u32 2147483648, %v3236_v19  ;;  %2231 = vrot.lane.b32.xlu0 %v2205_v17, %s3276_s10 }
 0x464   :  { %v1642_v3 = vxor.u32 2147483648, %v3238_v39 }
 0x465   :  { %v1646_v15 = vsel %vm1644_vm3, %v1645_v34, %v3238_v39  ;;  %v1953_v33 = vsel %vm1951_vm5, %v1645_v34, %v3238_v39  ;;  %vm2054_vm3 = vcmp.eq.s32.totalorder %v2049_v41, 2 }
 0x466   :  { %v1643_v38 = vsel %vm1641_vm1, %v3236_v19, %v1642_v3  ;;  %v1950_v42 = vsel %vm1948_vm4, %v3236_v19, %v1642_v3  ;;  %vm2050_vm4 = vcmp.lt.s32.totalorder %v2049_v41, 2 }
 0x467   :  { %v1647_v10 = vsel %vm1640_vm7, %v1643_v38, %v1646_v15  ;;  %v1954_v4 = vsel %vm1947_vm8, %v1950_v42, %v1953_v33 }
 0x468   :  { %v1648_v13 = vsel %vm1637_vm11, nan, %v1647_v10  ;;  %v1955_v46 = vsel %vm1637_vm11, nan, %v1954_v4 }
 0x469   :  { %2807 = vmatprep.mubr.msk.f32.mxu0 %vm1358_vm10, %v1648_v13  ;;  %v3240_v54 = vpop.eup %3239 }
 0x46a   :  { %v3242_v20 = vpop.eup %3241  ;;  %v1749_v30 = vxor.u32 2147483648, %v3240_v54 }
 0x46b   :  { %v1746_v61 = vxor.u32 2147483648, %v3242_v20 }
 0x46c   :  { %v1750_v40 = vsel %vm1748_vm12, %v1749_v30, %v3242_v20  ;;  %v2056_v43 = vsel %vm2054_vm3, %v1749_v30, %v3242_v20 }
 0x46d   :  { %v1747_v29 = vsel %vm1745_vm13, %v3240_v54, %v1746_v61  ;;  %v2053_v56 = vsel %vm2051_vm2, %v3240_v54, %v1746_v61 }
 0x46e   :  { %v1751_v45 = vsel %vm1744_vm14, %v1747_v29, %v1750_v40  ;;  %v2057_v1 = vsel %vm2050_vm4, %v2053_v56, %v2056_v43 }
 0x46f   :  { %v1752_v57 = vsel %vm1741_vm15, nan, %v1751_v45 }
 0x470   :  { %2808 = vmatmul.mubr.msk.f32.vlgmr.msra.gmra.mrb[6].mxu0 %vm1358_vm10, %v1752_v57 }
 0x471   :  { %2993 = vmatpush3.bf16.msra.mxu0 %v3671_v9  ;;  %2824 = vmatprep.mubr.msk.f32.mxu0 %vm1358_vm10, %v1955_v46  ;;  %v2058_v9 = vsel %vm1741_vm15, nan, %v2057_v1 }
 0x472   :  { %2995 = vmatprep.subr.bf16.mxu0 %v2994_v6 }
 0x475   :  { %2997 = vmatpush3.bf16.msra.mxu0 %v2994_v6 }
 0x476   :  { %2999 = vmatprep.subr.bf16.mxu0 %v2998_v5 }
 0x479   :  { %3001 = vmatpush3.bf16.msra.mxu0 %v2998_v5 }
 0x47a   :  { %2822 = vmatprep.subr.msk.mxu0 %vm1041_vm6, %v2078_v31 }
 0x47d   :  { %2823 = vmatpush3.msk.msra.mxu0 %vm1041_vm6, %v2078_v31 }
 0x47e   :  { %2825 = vmatmul.mubr.msk.f32.vlgmr.msra.gmra.mrb[6].mxu0 %vm1358_vm10, %v2058_v9  ;;  %3003 = vmatprep.subr.bf16.mxu0 %v3002_v36 }
 0x47f   :  { %3005 = vmatpush3.bf16.msra.mxu0 %v3002_v36 }
 0x480   :  { %3007 = vmatprep.subr.bf16.mxu0 %v3006_v48 }
 0x483   :  { %3009 = vmatpush3.bf16.msra.mxu0 %v3006_v48 }
 0x484   :  { %3011 = vmatprep.subr.bf16.mxu0 %v3010_v50 }
 0x487   :  { %3013 = vmatpush3.bf16.msra.mxu0 %v3010_v50 }
 0x4d5   :  { %v2232_v58 = vpop.permute.xlu0 %2231 }
 0x551   :  { %v2826_v21 = vpop.f32.mrb[6].mxu0 }
 0x552   :  { %v2175_v22 = vadd.f32 %v2826_v21, %v2172_v14  ;;  %v2159_v23 = vpop.f32.mrb[7].mxu0 }
 0x553   :  { %v2174_v18 = vadd.f32 %v2172_v14, %v2159_v23 }
 0x554   :  { %v2400_v26 = vmul.f32 -1.442695, %v2175_v22 }
 0x555   :  { %v2399_v24 = vmul.f32 -1.442695, %v2174_v18 }
 0x556   :  { %3243 = vpow2.f32 %v2400_v26 }
 0x557   :  { %3245 = vpow2.f32 %v2399_v24 }
 0x560   :  { %v3244_v62 = vpop.eup %3243 }
 0x561   :  { %v3246_v47 = vpop.eup %3245  ;;  %v2183_v25 = vadd.f32 1.0, %v3244_v62 }
 0x562   :  { %v2182_v28 = vadd.f32 1.0, %v3246_v47 }
 0x564   :  { %3247 = vrcp.f32 %v2182_v28 }
 0x565   :  { %3249 = vrcp.f32 %v2183_v25 }
 0x56e   :  { %v3248_v19 = vpop.eup %3247 }
 0x56f   :  { %v3250_v32 = vpop.eup %3249  ;;  %2839 = vmatprep.mubr.msk.f32.mxu0 %vm31_vm0, %v3248_v19 }
 0x570   :  { %2840 = vmatmul.mubr.msk.f32.vlgmr.msra.gmra.mrb[8].mxu0 %vm31_vm0, %v3250_v32 }
 0x643   :  { %v2841_v39 = vpop.f32.mrb[8].mxu0 }
 0x644   :  { %v2312_v34 = vadd.f32 %v2841_v39, %v2232_v58  ;;  %v2306_v3 = vpop.f32.mrb[9].mxu0 }
 0x645   :  { %v2307_v15 = vadd.f32 %v2306_v3, %v2232_v58 }
 0x646   :  { %v2404_v11 = vmul.f32 -1.442695, %v2312_v34 }
 0x647   :  { %v2403_v33 = vmul.f32 -1.442695, %v2307_v15 }
 0x648   :  { %3251 = vpow2.f32 %v2404_v11 }
 0x649   :  { %3253 = vpow2.f32 %v2403_v33 }
 0x652   :  { %v3252_v38 = vpop.eup %3251 }
 0x653   :  { %v3254_v42 = vpop.eup %3253  ;;  %v2322_v10 = vadd.f32 1.0, %v3252_v38 }
 0x654   :  { %v2321_v4 = vadd.f32 1.0, %v3254_v42 }
 0x655   :  { %3255 = vrcp.f32 %v2322_v10 }
 0x656   :  { %3257 = vrcp.f32 %v2321_v4 }
 0x65f   :  { %v3256_v0 = vpop.eup %3255 }
 0x660   :  { %v3258_v13 = vpop.eup %3257  ;;  %2328 = vst.msk [vmem:[%s3823_s2 + $0x8] sm:$0xff] %vm1227_vm9, %v3256_v0 }
 0x661   :  { %2327 = vst.msk [vmem:[%s3823_s2] sm:$0xff] %vm1227_vm9, %v3258_v13 }

</bundles_post_ra>
